<compile_context>
chip_gen: v7x
topology: tpu7x:2x2x1
jax: 0.10.0
libtpu: 0.0.40
codegen_flags: <defaults>
</compile_context>

<pallas_src>
import functools

import jax
import jax.numpy as jnp
from jax.experimental import pallas as pl
from jax.experimental.pallas import tpu as pltpu


def _pick_vmem_limit():
    """Generation-aware VMEM limit: ~3/4 of physical per-core VMEM."""
    cap = None
    try:
        cap = getattr(pltpu.get_tpu_info(), "vmem_capacity_bytes", None)
    except Exception:
        cap = None
    if not cap:
        cap = 64 * 1024 * 1024          # assume the smallest (v7x: 64 MiB / TC)
    return int(min(cap * 3 // 4, 112 * 1024 * 1024))


def _fused_conv_kernel(x_ref, w_ref, b_ref, out_ref, *,
                       kh, kw, stride, th, w_out, cin, x_resident, tap_dots):
    """One grid step = (batch n) x (Cout tile) x (tile of output rows).

    x_ref  : resident: (Hp, Wp, Cin)   bf16 whole padded image (per batch)
             windowed: (win_h, Wp, Cin) bf16 halo window for this row tile
    w_ref  : (KH*KW*Cin, TCo) bf16  alpha-combined im2col weight slab tile
    b_ref  : (1, TCo)         f32   alpha-combined bias tile
    out_ref: (TH*Wout, TCo)         lane-dense flat output tile
    """
    win_h = (th - 1) * stride + kh
    if x_resident:
        ti = pl.program_id(2)
        row0 = pl.multiple_of(ti * (th * stride), th * stride)
        x = x_ref[pl.ds(row0, win_h)]                 # (win_h, Wp, Cin) bf16
    else:
        x = x_ref[...]                                # (win_h, Wp, Cin) bf16

    m = th * w_out

    def tap(r, c):
        # One (r, c) kernel tap as a (TH*Wout, Cin) bf16 matrix (stays in bf16).
        t = jax.lax.slice(
            x, (r, c, 0),
            (r + stride * (th - 1) + 1, c + stride * (w_out - 1) + 1, cin),
            (stride, stride, 1))
        return t.reshape(m, cin)

    if tap_dots:
        # Large Cin: kh*kw accumulated MXU dots -> no lane-axis concatenate
        # relayouts when Cin is not a multiple of 128.
        acc = jnp.zeros((m, w_ref.shape[1]), jnp.float32)
        for r in range(kh):
            for c in range(kw):
                k0 = (r * kw + c) * cin
                acc = acc + jnp.dot(tap(r, c), w_ref[k0:k0 + cin, :],
                                    preferred_element_type=jnp.float32)
    else:
        # Small Cin: concatenate the bf16 taps and contract K = kh*kw*cin at once.
        patch = jnp.concatenate(
            [tap(r, c) for r in range(kh) for c in range(kw)], axis=-1)
        acc = jnp.dot(patch, w_ref[...], preferred_element_type=jnp.float32)

    # Bias added in the flat (m, TCo) shape; store is a flat lane-dense block.
    out_ref[...] = (acc + b_ref[...]).astype(out_ref.dtype)


def search_multi_conv2d(x_nchw, branch_weights, branch_biases, alpha,
                        stride=1, padding=1, *, out_dtype=jnp.float32,
                        row_tile=None, x_resident=None, tap_dots=None):
    """Weighted multi-branch conv, algebraically collapsed to one conv.

    x_nchw:         (N, Cin, H, W)          float32
    branch_weights: (B, Cout, Cin, KH, KW)  per-branch channel-masked weights
    branch_biases:  (B, Cout)
    alpha:          (B,)
    """
    n, cin, h, w = x_nchw.shape
    _, cout, _, kh, kw = branch_weights.shape
    h_out = (h + 2 * padding - kh) // stride + 1
    w_out = (w + 2 * padding - kw) // stride + 1

    alpha = alpha.astype(jnp.float32)
    # Linearity: sum_i a_i*(conv(x, W_i) + b_i) == conv(x, sum_i a_i*W_i) + sum_i a_i*b_i
    w_eff = jnp.tensordot(alpha, branch_weights.astype(jnp.float32), axes=1)  # (Cout,Cin,KH,KW)
    b_eff = jnp.tensordot(alpha, branch_biases.astype(jnp.float32), axes=1)   # (Cout,)

    vmem_limit = _pick_vmem_limit()

    # Lane-dense Cout padding; tile Cout for big layers (smaller resident weights,
    # more parallel blocks for v7x's 2 TensorCores).
    cout_p128 = -(-cout // 128) * 128
    tco = 256 if cout_p128 >= 512 else cout_p128
    cout_p = -(-cout // tco) * tco
    n_co = cout_p // tco

    # Output-row tile: target ~1024 output rows per MXU call, bounded by VMEM.
    if row_tile is None:
        th = min(h_out, max(8, -(-1024 // w_out)))
        while th > 8 and 2 * th * w_out * tco * 4 > vmem_limit // 4:
            th //= 2
    else:
        th = min(row_tile, h_out)
    if (th * w_out) % 8 != 0:                 # keep the flat store sublane-aligned
        t = th
        while t < h_out and (t * w_out) % 8 != 0:
            t += 1
        th = t if (t * w_out) % 8 == 0 else h_out
    n_ti = pl.cdiv(h_out, th)

    # bf16 BEFORE transpose/pad (halves HBM traffic of these wrapper ops).
    x_nhwc = jnp.transpose(x_nchw.astype(jnp.bfloat16), (0, 2, 3, 1))
    wp = w + 2 * padding
    hp_need = (n_ti * th - 1) * stride + kh   # last tile's window must be in bounds
    extra_h = max(0, hp_need - (h + 2 * padding))
    hp = h + 2 * padding + extra_h
    x_pad = jnp.pad(x_nhwc, ((0, 0), (padding, padding + extra_h),
                             (padding, padding), (0, 0)))

    # im2col weight slab (KH*KW*Cin, Cout_p) + bias, lane-dense.
    k_dim = kh * kw * cin
    w_slab = jnp.transpose(w_eff, (2, 3, 1, 0)).reshape(k_dim, cout)
    w_slab = jnp.pad(w_slab, ((0, 0), (0, cout_p - cout))).astype(jnp.bfloat16)
    b_slab = jnp.pad(b_eff, (0, cout_p - cout)).reshape(1, cout_p)   # f32

    win_h = (th - 1) * stride + kh

    # Keep the whole padded image resident only if it comfortably fits the
    # per-generation VMEM budget; otherwise stream per-tile halo windows.
    if x_resident is None:
        resident_bytes = 2 * hp * wp * cin * 2                       # dbl-buffered bf16
        step_bytes = (2 * k_dim * tco * 2 + 2 * th * w_out * tco * 4
                      + th * w_out * k_dim * 2 + (1 << 20))
        x_resident = resident_bytes + step_bytes <= (vmem_limit * 2) // 3

    if x_resident:
        x_arg = x_pad
        x_spec = pl.BlockSpec((None, hp, wp, cin),
                              lambda ni, co, ti: (ni, 0, 0, 0))
    else:
        # Wrapper-materialised halo windows (~(kh-stride)/(th*stride) extra bytes)
        # -> per-tile streaming DMAs, bounded VMEM regardless of image size.
        x_win = jnp.stack([x_pad[:, i * th * stride: i * th * stride + win_h]
                           for i in range(n_ti)], axis=1)
        x_arg = x_win.reshape(n * n_ti, win_h, wp, cin)
        x_spec = pl.BlockSpec((None, win_h, wp, cin),
                              lambda ni, co, ti: (ni * n_ti + ti, 0, 0, 0))

    if tap_dots is None:
        tap_dots = cin >= 64

    kernel = functools.partial(_fused_conv_kernel, kh=kh, kw=kw, stride=stride,
                               th=th, w_out=w_out, cin=cin,
                               x_resident=bool(x_resident),
                               tap_dots=bool(tap_dots))

    out_flat = pl.pallas_call(
        kernel,
        out_shape=jax.ShapeDtypeStruct((n, h_out * w_out, cout_p), out_dtype),
        grid=(n, n_co, n_ti),
        in_specs=[
            x_spec,
            # Alpha-combined weight slab tile (constant along n / row tiles).
            pl.BlockSpec((k_dim, tco), lambda ni, co, ti: (0, co)),
            # Alpha-combined bias tile.
            pl.BlockSpec((1, tco), lambda ni, co, ti: (0, co)),
        ],
        # Flat, lane-dense output tile (unmasked vst for full 128-lane columns).
        out_specs=pl.BlockSpec((None, th * w_out, tco),
                               lambda ni, co, ti: (ni, ti, co)),
        compiler_params=pltpu.CompilerParams(
            dimension_semantics=("parallel", "parallel", "parallel"),
            vmem_limit_bytes=vmem_limit),
    )(x_arg, w_slab, b_slab)

    # Drop Cout padding, restore (N, Cout, Hout, Wout), f32 like the PyTorch module.
    out = out_flat[..., :cout].reshape(n, h_out, w_out, cout)
    return jnp.transpose(out, (0, 3, 1, 2)).astype(jnp.float32)


# ------------------------- reference (pure JAX, f32) -----------------------
def _reference(x_nchw, original_weight, original_bias, alpha,
               selected_sets, stride, padding):
    out = None
    for i, sel in enumerate(selected_sets):
        x_sel = x_nchw[:, sel, :, :]
        w_sel = original_weight[:, sel, :, :]
        y = jax.lax.conv_general_dilated(
            x_sel, w_sel, window_strides=(stride, stride),
            padding=[(padding, padding), (padding, padding)],
            dimension_numbers=("NCHW", "OIHW", "NCHW"))
        y = y + original_bias[None, :, None, None]
        out = alpha[i] * y if out is None else out + alpha[i] * y
    return out


def make_ordered_branches(original_weight, original_bias, channel_options):
    """Mirror SearchMultiConv2d.init_multi_branchs (ordered-channels path)."""
    cin = original_weight.shape[1]
    importance = jnp.abs(original_weight).sum(axis=(0, 2, 3))
    channel_indices = jnp.argsort(-importance)
    branch_weights, branch_biases, selected_sets = [], [], []
    for c_opt in channel_options:
        sel = jnp.sort(channel_indices[:c_opt])            # nonzero() -> sorted
        selected_sets.append(sel)
        mask = jnp.zeros((cin,), jnp.float32).at[sel].set(1.0)
        # Zero-masked full weight == index_select weight on selected channels.
        branch_weights.append(original_weight * mask[None, :, None, None])
        branch_biases.append(original_bias)
    return jnp.stack(branch_weights), jnp.stack(branch_biases), selected_sets


def _run_case(key, *, n, cin, h, w, cout, kh, kw, stride, padding,
              channel_options, rtol, atol, **overrides):
    k_x, k_w, k_b, k_a = jax.random.split(key, 4)
    x = jax.random.normal(k_x, (n, cin, h, w), jnp.float32)
    original_weight = jax.random.normal(k_w, (cout, cin, kh, kw), jnp.float32) * 0.1
    original_bias = jax.random.normal(k_b, (cout,), jnp.float32) * 0.1
    alpha = jax.nn.softmax(
        jax.random.normal(k_a, (len(channel_options),), jnp.float32))

    bw, bb, sels = make_ordered_branches(original_weight, original_bias,
                                         channel_options)
    out = search_multi_conv2d(x, bw, bb, alpha, stride=stride, padding=padding,
                              **overrides)
    out = jax.block_until_ready(out)
    ref = jax.block_until_ready(
        _reference(x, original_weight, original_bias, alpha, sels, stride, padding))

    h_out = (h + 2 * padding - kh) // stride + 1
    w_out = (w + 2 * padding - kw) // stride + 1
    assert out.shape == (n, cout, h_out, w_out), out.shape
    max_err = float(jnp.max(jnp.abs(out - ref)))
    # bf16 inputs/weights with f32 accumulation -> loosened tolerance.
    assert jnp.allclose(out, ref, rtol=rtol, atol=atol), max_err


if __name__ == "__main__":
    key = jax.random.PRNGKey(0)
    k1, k2 = jax.random.split(key)

    # Case 1: module-scale config (auto path: resident image, single im2col dot).
    _run_case(k1, n=2, cin=4, h=16, w=16, cout=8, kh=3, kw=3,
              stride=1, padding=1, channel_options=[2, 3, 4],
              rtol=3e-2, atol=3e-2)

    # Case 2: exercises the streamed halo-window path, the per-tap-dot path and
    # cdiv row tiling with a partial (masked) last tile.
    _run_case(k2, n=1, cin=16, h=8, w=8, cout=16, kh=3, kw=3,
              stride=1, padding=1, channel_options=[8, 16],
              rtol=3e-2, atol=5e-2,
              x_resident=False, tap_dots=True, row_tile=5)

    print("KERNEL_OK")
</pallas_src>

<mosaic_0001>
module attributes {stable_mosaic.version = 11 : i64} {
  func.func @_fused_conv_kernel(%arg0: i32, %arg1: i32, %arg2: i32, %arg3: memref<1x18x18x4xbf16, #tpu.memory_space<vmem>>, %arg4: memref<36x128xbf16, #tpu.memory_space<vmem>>, %arg5: memref<1x128xf32, #tpu.memory_space<vmem>>, %arg6: memref<1x256x128xf32, #tpu.memory_space<vmem>>) attributes {dimension_semantics = [#tpu.dimension_semantics<parallel>, #tpu.dimension_semantics<parallel>, #tpu.dimension_semantics<parallel>], iteration_bounds = array<i64: 2, 1, 1>, scalar_prefetch = 0 : i64, scratch_operands = 0 : i64, tpu.core_type = #tpu.core_type<tc>, window_params = [{transform_indices = @transform_0, window_bounds = array<i64: 1, 18, 18, 4>}, {transform_indices = @transform_1, window_bounds = array<i64: 36, 128>}, {transform_indices = @transform_2, window_bounds = array<i64: 1, 128>}, {transform_indices = @transform_3, window_bounds = array<i64: 1, 256, 128>}]} {
    %c16_i32 = arith.constant 16 : i32
    %0 = arith.muli %arg2, %c16_i32 : i32
    %1 = tpu.assume_multiple %0, 16 : i32
    %c0 = arith.constant 0 : index
    %2 = arith.index_cast %1 : i32 to index
    %c0_0 = arith.constant 0 : index
    %c0_1 = arith.constant 0 : index
    %3 = vector.load %arg3[%c0, %2, %c0_0, %c0_1] : memref<1x18x18x4xbf16, #tpu.memory_space<vmem>>, vector<1x18x18x4xbf16>
    %4 = vector.shape_cast %3 : vector<1x18x18x4xbf16> to vector<18x18x4xbf16>
    %5 = vector.extract_strided_slice %4 {offsets = [0, 0, 0], sizes = [16, 16, 4], strides = [1, 1, 1]} : vector<18x18x4xbf16> to vector<16x16x4xbf16>
    %6 = vector.shape_cast %5 : vector<16x16x4xbf16> to vector<256x4xbf16>
    %7 = vector.extract_strided_slice %4 {offsets = [0, 1, 0], sizes = [16, 16, 4], strides = [1, 1, 1]} : vector<18x18x4xbf16> to vector<16x16x4xbf16>
    %8 = vector.shape_cast %7 : vector<16x16x4xbf16> to vector<256x4xbf16>
    %9 = vector.extract_strided_slice %4 {offsets = [0, 2, 0], sizes = [16, 16, 4], strides = [1, 1, 1]} : vector<18x18x4xbf16> to vector<16x16x4xbf16>
    %10 = vector.shape_cast %9 : vector<16x16x4xbf16> to vector<256x4xbf16>
    %11 = vector.extract_strided_slice %4 {offsets = [1, 0, 0], sizes = [16, 16, 4], strides = [1, 1, 1]} : vector<18x18x4xbf16> to vector<16x16x4xbf16>
    %12 = vector.shape_cast %11 : vector<16x16x4xbf16> to vector<256x4xbf16>
    %13 = vector.extract_strided_slice %4 {offsets = [1, 1, 0], sizes = [16, 16, 4], strides = [1, 1, 1]} : vector<18x18x4xbf16> to vector<16x16x4xbf16>
    %14 = vector.shape_cast %13 : vector<16x16x4xbf16> to vector<256x4xbf16>
    %15 = vector.extract_strided_slice %4 {offsets = [1, 2, 0], sizes = [16, 16, 4], strides = [1, 1, 1]} : vector<18x18x4xbf16> to vector<16x16x4xbf16>
    %16 = vector.shape_cast %15 : vector<16x16x4xbf16> to vector<256x4xbf16>
    %17 = vector.extract_strided_slice %4 {offsets = [2, 0, 0], sizes = [16, 16, 4], strides = [1, 1, 1]} : vector<18x18x4xbf16> to vector<16x16x4xbf16>
    %18 = vector.shape_cast %17 : vector<16x16x4xbf16> to vector<256x4xbf16>
    %19 = vector.extract_strided_slice %4 {offsets = [2, 1, 0], sizes = [16, 16, 4], strides = [1, 1, 1]} : vector<18x18x4xbf16> to vector<16x16x4xbf16>
    %20 = vector.shape_cast %19 : vector<16x16x4xbf16> to vector<256x4xbf16>
    %21 = vector.extract_strided_slice %4 {offsets = [2, 2, 0], sizes = [16, 16, 4], strides = [1, 1, 1]} : vector<18x18x4xbf16> to vector<16x16x4xbf16>
    %22 = vector.shape_cast %21 : vector<16x16x4xbf16> to vector<256x4xbf16>
    %23 = tpu.concatenate %6, %8, %10, %12, %14, %16, %18, %20, %22 in 1 : vector<256x4xbf16>, vector<256x4xbf16>, vector<256x4xbf16>, vector<256x4xbf16>, vector<256x4xbf16>, vector<256x4xbf16>, vector<256x4xbf16>, vector<256x4xbf16>, vector<256x4xbf16> -> vector<256x36xbf16>
    %c0_2 = arith.constant 0 : index
    %c0_3 = arith.constant 0 : index
    %24 = vector.load %arg4[%c0_2, %c0_3] : memref<36x128xbf16, #tpu.memory_space<vmem>>, vector<36x128xbf16>
    %cst = arith.constant dense<0.000000e+00> : vector<256x128xf32>
    %25 = tpu.matmul %23, %24, %cst {dimension_numbers = #tpu.dot_dimension_numbers<[1], [0], [0], [1], [0, 0, 1, 1], [], []>} : vector<256x36xbf16>, vector<36x128xbf16>, vector<256x128xf32> -> vector<256x128xf32>
    %c0_4 = arith.constant 0 : index
    %c0_5 = arith.constant 0 : index
    %26 = vector.load %arg5[%c0_4, %c0_5] : memref<1x128xf32, #tpu.memory_space<vmem>>, vector<1x128xf32>
    %27 = vector.broadcast %26 : vector<1x128xf32> to vector<256x128xf32>
    %28 = arith.addf %25, %27 : vector<256x128xf32>
    %c0_6 = arith.constant 0 : index
    %c0_7 = arith.constant 0 : index
    %c0_8 = arith.constant 0 : index
    %29 = vector.load %arg6[%c0_6, %c0_7, %c0_8] : memref<1x256x128xf32, #tpu.memory_space<vmem>>, vector<1x256x128xf32>
    %30 = vector.shape_cast %29 : vector<1x256x128xf32> to vector<256x128xf32>
    %31 = vector.shape_cast %28 : vector<256x128xf32> to vector<1x256x128xf32>
    tpu.vector_store %arg6[%c0_6, %c0_7, %c0_8], %31 {strides = array<i32>} : memref<1x256x128xf32, #tpu.memory_space<vmem>>, vector<1x256x128xf32>,
    return
  }
  func.func @transform_0(%arg0: i32, %arg1: i32, %arg2: i32) -> (i32, i32, i32, i32) {
    %c0_i32 = arith.constant 0 : i32
    %c0_i32_0 = arith.constant 0 : i32
    %c0_i32_1 = arith.constant 0 : i32
    %c0_i32_2 = arith.constant 0 : i32
    return %arg0, %c0_i32, %c0_i32_0, %c0_i32_1 : i32, i32, i32, i32
  }
  func.func @transform_1(%arg0: i32, %arg1: i32, %arg2: i32) -> (i32, i32) {
    %c0_i32 = arith.constant 0 : i32
    %c0_i32_0 = arith.constant 0 : i32
    return %c0_i32, %arg1 : i32, i32
  }
  func.func @transform_2(%arg0: i32, %arg1: i32, %arg2: i32) -> (i32, i32) {
    %c0_i32 = arith.constant 0 : i32
    %c0_i32_0 = arith.constant 0 : i32
    return %c0_i32, %arg1 : i32, i32
  }
  func.func @transform_3(%arg0: i32, %arg1: i32, %arg2: i32) -> (i32, i32, i32) {
    %c0_i32 = arith.constant 0 : i32
    return %arg0, %arg2, %arg1 : i32, i32, i32
  }
}

</mosaic_0001>

<bundles_post_ra>
// kernel: tpu_custom_call.1
= control target key start
LH: loop header
LB: loop body
LE: loop exit
PB: predicated region body
PF: predicated region fallthrough
CT: control target
= control target key end

     0   :  { %8 = vsyncpa [#allocation3], 0  ;;  %s3635_s0 = inlined_call_operand.vmem [shape: bf16[2,18,18,4], index: 0, kind: input, shape index: {}]   ;;  %s3636_s1 = inlined_call_operand.vmem [shape: bf16[36,128], index: 1, kind: input, shape index: {}]   ;;  %s3637_s2 = inlined_call_operand.vmem [shape: f32[1,128], index: 2, kind: input, shape index: {}]   ;;  %s3638_s3 = inlined_call_operand.hbm [shape: f32[2,256,128], index: 3, kind: output, shape index: {}]  }
   0x1   :  { %10 = vsyncpa [#allocation3 + $0x1], 0  ;;  %s2347_s12 = smov 0   ;;  %s2349_s13 = smov 0  }
   0x2   :  { %s2351_s14 = smov 0   ;;  %s2353_s15 = smov 0  }
   0x3   :  { %s2355_s16 = smov 0   ;;  %s2357_s17 = smov 0  }
   0x4 LB: > { %s1979_s18 = sadd.s32 4294967295, %s2315_s17   ;;  %s1980_s19 = sadd.s32 4294967294, %s2315_s17   ;;  %s2315_s17 = sphi %s2357_s17, %s16_s17   ;;  %s2311_s16 = sphi %s2355_s16, %s3670_s16   ;;  %s2307_s15 = sphi %s2353_s15, %s3669_s15   ;;  %s2303_s14 = sphi %s2351_s14, %s3668_s14   ;;  %s2299_s13 = sphi %s2349_s13, %s3667_s13   ;;  %s2295_s12 = sphi %s2347_s12, %s3666_s12  }
   0x5   : > { %s35_s20 = sadd.s32 1, %s2311_s16  ;;  %s124_s21 = sadd.s32 1, %s2303_s14 }
   0x6   : > { %p37_p0 = scmp.ge.s32.totalorder %s35_s20, 2  ;;  %p134_p1 = scmp.ne.s32.totalorder %s2303_s14, %s2299_s13 }
   0x7   : > { %p135_p2 = scmp.eq.s32.totalorder %s1979_s18, 1  ;;  %p140_p3 = scmp.ne.s32.totalorder %s2299_s13, %s2295_s12 }
   0x8   : > { %s3672_s20 = smov (%p37_p0, %s35_s20), 0  ;;  %p141_p5 = scmp.eq.s32.totalorder %s1980_s19, 1 }
   0x9   : > { %p2387_p4 = por %p135_p2, %p134_p1  ;;  %s117_s23 = ssub.s32 %s2311_s16, %s3672_s20 }
   0xa   : > { %p1985_p6 = scmp.ge.s32.totalorder %s2315_s17, 1  ;;  %p122_p7 = scmp.eq.s32.totalorder %s117_s23, 0 }
   0xb   : > { %p2394_p8 = por %p141_p5, %p140_p3  ;;  %p180_p9 = scmp.lt.s32.totalorder %s2315_s17, 3 }
   0xc   : > { %s2400_s25 = scalar_select %p122_p7, %s2303_s14, %s124_s21  }
   0xd   : > { %p181_p10 = pnand %p1985_p6, %p180_p9 }
   0xf   : > { %184 = sbr.rel (%p181_p10) target bundleno = 647 (0x287), region = 32 }
  0x16   : > { %p211_p11 = scmp.lt.s32.totalorder %s2307_s15, 1  ;;  %vm718_vm0 = vcmask 1042432   ;;  %vm719_vm1 = vcmask 1046532   ;;  %vm283_vm2 = vsmask.f32 3328  ;;  %s2317_s4 = smov 12  }
  0x17   : > { %vm284_vm3 = vsmask.f32 7440  ;;  %vm2439_vm4 = vmor %vm718_vm0, %vm719_vm1  ;;  %s2318_s5 = smov 8   ;;  %s2319_s6 = smov 4   ;;  %vm1659_vm6 = vcmask 1041408   ;;  %vm1319_vm7 = vcmask 31744  }
  0x18   : > { %s212_s26 = scalar_select %p211_p11, %s2307_s15, 1  ;;  %vm2484_vm5 = vmor %vm283_vm2, %vm284_vm3  ;;  %vm1368_vm8 = vcmask 64512   ;;  %vm1401_vm9 = vcmask 97280   ;;  %vm1434_vm10 = vcmask 130048   ;;  %vm1467_vm11 = vcmask 162816  }
  0x19   : > { %s2320_s7 = smov 16   ;;  %s2321_s8 = smov 20   ;;  %vm1500_vm12 = vcmask 195584   ;;  %vm1533_vm13 = vcmask 228352   ;;  %vm1566_vm14 = vcmask 261120   ;;  %vm1626_vm15 = vcmask 293888  }
  0x1a   : > { %s2151_s27 = smul.u32 216, %s212_s26  ;;  %s2322_s9 = smov 24  }
  0x1b   : > { %s2323_s18 = smov 28   ;;  %s2324_s23 = smov 32  }
  0x1c   : > { %s2407_s30 = scalar_lea.vmem %s3635_s0, %s2151_s27  ;;  %s208_s28 = sand.u32 1, %s2299_s13  }
  0x1d   : > { %v2410_v0 = vld [vmem:[%s2407_s30 + $0x6c] sm:$0xf]  ;;  %v2413_v1 = vld [vmem:[%s2407_s30 + $0x70] sm:$0xf]  ;;  %v2427_v12 = vld [vmem:[%s2407_s30 + $0x60] sm:$0xf] }
  0x1e   : > { %v232_v2 = vld [vmem:[%s2407_s30 + $0xc] sm:$0xf]  ;;  %v516_v3 = vshrl.u32 %v2413_v1, 16  ;;  %v2419_v4 = vcombine.low %v2410_v0, %v2413_v1  ;;  %v503_v5 = vshrl.u32 %v2410_v0, 16  ;;  %v506_v6 = vshll.u32 %v2410_v0, 16  ;;  %s1986_s29 = sshll.u32 %s208_s28, 8 }
  0x1f   : > { %v233_v7 = vld [vmem:[%s2407_s30 + $0x10] sm:$0xf]  ;;  %v311_v11 = vshrl.u32 %v232_v2, 16  ;;  %v314_v13 = vshll.u32 %v232_v2, 16  ;;  %v2432_v14 = vld [vmem:[%s2407_s30 + $0x64] sm:$0xf] }
  0x20   : > { %v320_v8 = vshll.u32 %v233_v7, 16  ;;  %v324_v9 = vshrl.u32 %v233_v7, 16  ;;  %v2424_v10 = vcombine.low %v232_v2, %v233_v7  ;;  %1128 = vrot.lane.b32.xlu1 %v2419_v4, %s2317_s4  ;;  %v2435_v15 = vld [vmem:[%s2407_s30 + $0x68] sm:$0x1]  ;;  %v1996_v17 = vrot.slane %v2427_v12, 9  ;;  %s2325_s19 = smov [#allocation2]  }
  0x21   : > { %v313_v19 = vrot.slane %v311_v11, 4  ;;  %v779_v20 = vrot.slane %v2432_v14, 5  ;;  %v782_v21 = vrot.slane %v2435_v15, 5  ;;  %v2449_v22 = vld [vmem:[%s2407_s30] sm:$0xf]  ;;  %v316_v23 = vrot.slane %v314_v13, 5 }
  0x22   : > { %v326_v18 = vrot.slane %v324_v9, 4  ;;  %1112 = vrot.lane.b32.xlu0 %v2424_v10, %s2317_s4  ;;  %v2452_v24 = vld [vmem:[%s2407_s30 + $0x4] sm:$0xf]  ;;  %v231_v25 = vld [vmem:[%s2407_s30 + $0x8] sm:$0x1]  ;;  %v1988_v26 = vrot.slane %v2449_v22, 9 }
  0x23   : > { %v780_v27 = vsel %vm2439_vm4, %v1996_v17, %v779_v20  ;;  %v781_v28 = vrot.slane %v779_v20, 4  ;;  %v723_v29 = vrot.slane %v2452_v24, 5  ;;  %v726_v30 = vrot.slane %v231_v25, 5  ;;  %v2460_v31 = vld [vmem:[%s2407_s30 + $0x74] sm:$0x1]  ;;  %s2241_s21 = sshll.u32 %s2325_s19, 4  ;;  %s2242_s21 = int_to_ptr.vmem [resolvable:$false] %s2241_s21 }
  0x24   : > { %v1997_v32 = vrot.slane %v2410_v0, 9  ;;  %v786_v33 = vrot.slane %v2413_v1, 5  ;;  %v789_v34 = vrot.slane %v2460_v31, 5  ;;  %v234_v35 = vld [vmem:[%s2407_s30 + $0x14] sm:$0x1]  ;;  %v1989_v36 = vrot.slane %v232_v2, 9 }
  0x25   : > { %v783_v37 = vsel %vm2439_vm4, %v781_v28, %v782_v21  ;;  %v724_v38 = vsel %vm2439_vm4, %v1988_v26, %v723_v29  ;;  %v725_v39 = vrot.slane %v723_v29, 4  ;;  %v730_v40 = vrot.slane %v233_v7, 5 }
  0x26   : > { %v2470_v41 = vcombine.low %v780_v27, %v783_v37  ;;  %v787_v42 = vsel %vm2439_vm4, %v1997_v32, %v786_v33  ;;  %v788_v43 = vrot.slane %v786_v33, 4  ;;  %v733_v44 = vrot.slane %v234_v35, 5 }
  0x27   : > { %v727_v45 = vsel %vm2439_vm4, %v725_v39, %v726_v30  ;;  %v731_v46 = vsel %vm2439_vm4, %v1989_v36, %v730_v40  ;;  %v732_v47 = vrot.slane %v730_v40, 4  ;;  %v317_v48 = vor.u32 %v316_v23, %v313_v19  ;;  %v2528_v39 = vld [vmem:[%s2407_s30 + $0x7c] sm:$0xf] }
  0x28   : > { %1093 = vrot.lane.b32.xlu1 %v2470_v41, %s2318_s5  ;;  %v2038_v49 = vcombine.low %v724_v38, %v727_v45  ;;  %v790_v50 = vsel %vm2439_vm4, %v788_v43, %v789_v34  ;;  %v322_v52 = vrot.slane %v320_v8, 5  ;;  %v330_v53 = vshll.u32 %v234_v35, 16  ;;  %v2523_v35 = vld [vmem:[%s2407_s30 + $0x78] sm:$0xf] }
  0x29   : > { %v2488_v54 = vcombine.low %v787_v42, %v790_v50  ;;  %v734_v55 = vsel %vm2439_vm4, %v732_v47, %v733_v44  ;;  %v318_v56 = vrot.slane %v317_v48, 4  ;;  %v287_v57 = vshrl.u32 %v2449_v22, 16  ;;  %v2540_v50 = vld [vmem:[%s2407_s30 + $0x1c] sm:$0xf] }
  0x2a   : > { %1077 = vrot.lane.b32.xlu0 %v2038_v49, %s2318_s5  ;;  %v2494_v58 = vcombine.low %v731_v46, %v734_v55  ;;  %v327_v59 = vor.u32 %v326_v18, %v322_v52  ;;  %v332_v60 = vrot.slane %v330_v53, 5  ;;  %v290_v61 = vshll.u32 %v2449_v22, 16  ;;  %v2537_v49 = vld [vmem:[%s2407_s30 + $0x18] sm:$0xf] }
  0x2b   : > { %3652 = vst [vmem:[#allocation5_spill] sm:$0xff] %v2488_v54  ;;  %v323_v62 = vsel %vm2484_vm5, %v318_v56, %v322_v52  ;;  %v289_v63 = vrot.slane %v287_v57, 4  ;;  %v296_v2 = vshll.u32 %v2452_v24, 16  ;;  %v300_v7 = vshrl.u32 %v2452_v24, 16 }
  0x2c   : > { %1095 = vrot.lane.b32.xlu1 %v2488_v54, %s2318_s5  ;;  %v328_v8 = vrot.slane %v327_v59, 4  ;;  %v292_v9 = vrot.slane %v290_v61, 5  ;;  %v306_v11 = vshll.u32 %v231_v25, 16  ;;  %v505_v13 = vrot.slane %v503_v5, 4 }
  0x2d   : > { %v298_v17 = vrot.slane %v296_v2, 5  ;;  %v302_v18 = vrot.slane %v300_v7, 4  ;;  %v508_v19 = vrot.slane %v506_v6, 5  ;;  %v512_v20 = vshll.u32 %v2413_v1, 16 }
  0x2e   : > { %1079 = vrot.lane.b32.xlu0 %v2494_v58, %s2318_s5  ;;  %v333_v21 = vsel %vm2484_vm5, %v328_v8, %v332_v60  ;;  %v293_v23 = vor.u32 %v292_v9, %v289_v63  ;;  %v308_v26 = vrot.slane %v306_v11, 5  ;;  %v518_v25 = vrot.slane %v516_v3, 4  ;;  %v261_v60 = vld [vmem:[%s2407_s30 + $0x80] sm:$0x1] }
  0x2f   : > { %v2514_v5 = vcombine.low %v323_v62, %v333_v21  ;;  %v303_v27 = vor.u32 %v302_v18, %v298_v17  ;;  %v509_v28 = vor.u32 %v508_v19, %v505_v13  ;;  %v514_v0 = vrot.slane %v512_v20, 5  ;;  %v2564_v20 = vld [vmem:[%s2407_s30 + $0x20] sm:$0x1] }
  0x30   : > { %v294_v6 = vrot.slane %v293_v23, 4  ;;  %v522_v29 = vshll.u32 %v2460_v31, 16  ;;  %v479_v30 = vshrl.u32 %v2427_v12, 16  ;;  %v482_v32 = vshll.u32 %v2427_v12, 16 }
  0x31   : > { %999 = vrot.lane.b32.xlu1 %v2514_v5, %s2319_s6  ;;  %v304_v1 = vrot.slane %v303_v27, 4  ;;  %v510_v33 = vrot.slane %v509_v28, 4  ;;  %v519_v3 = vor.u32 %v518_v25, %v514_v0  ;;  %v488_v34 = vshll.u32 %v2432_v14, 16 }
  0x32   : > { %v299_v31 = vsel %vm2484_vm5, %v294_v6, %v298_v17  ;;  %v524_v36 = vrot.slane %v522_v29, 5  ;;  %v481_v37 = vrot.slane %v479_v30, 4  ;;  %v484_v38 = vrot.slane %v482_v32, 5 }
  0x33   : > { %v309_v40 = vsel %vm2484_vm5, %v304_v1, %v308_v26  ;;  %v515_v42 = vsel %vm2484_vm5, %v510_v33, %v514_v0  ;;  %v520_v43 = vrot.slane %v519_v3, 4  ;;  %v490_v44 = vrot.slane %v488_v34, 5 }
  0x34   : > { %v2022_v45 = vcombine.low %v299_v31, %v309_v40  ;;  %v485_v46 = vor.u32 %v484_v38, %v481_v37  ;;  %v492_v47 = vshrl.u32 %v2432_v14, 16  ;;  %v498_v48 = vshll.u32 %v2435_v15, 16 }
  0x35   : > { %v525_v52 = vsel %vm2484_vm5, %v520_v43, %v524_v36  ;;  %v527_v53 = vshrl.u32 %v2523_v35, 16  ;;  %v530_v55 = vshll.u32 %v2523_v35, 16  ;;  %v540_v56 = vshrl.u32 %v2528_v39, 16 }
  0x36   : > { %997 = vrot.lane.b32.xlu0 %v2022_v45, %s2319_s6  ;;  %v2548_v57 = vcombine.low %v515_v42, %v525_v52  ;;  %v486_v59 = vrot.slane %v485_v46, 4  ;;  %v494_v15 = vrot.slane %v492_v47, 4  ;;  %v500_v61 = vrot.slane %v498_v48, 5  ;;  %v2591_v52 = vld [vmem:[%s2407_s30 + $0x84] sm:$0xf] }
  0x37   : > { %v335_v62 = vshrl.u32 %v2537_v49, 16  ;;  %v338_v63 = vshll.u32 %v2537_v49, 16  ;;  %v348_v2 = vshrl.u32 %v2540_v50, 16  ;;  %v2560_v9 = vcombine.low %v2523_v35, %v2528_v39 }
  0x38   : > { %3653 = vst [vmem:[#allocation6_spill] sm:$0xff] %v2548_v57  ;;  %1015 = vrot.lane.b32.xlu1 %v2548_v57, %s2319_s6  ;;  %v491_v7 = vsel %vm2484_vm5, %v486_v59, %v490_v44  ;;  %v495_v8 = vor.u32 %v494_v15, %v490_v44  ;;  %v529_v11 = vrot.slane %v527_v53, 4  ;;  %v532_v13 = vrot.slane %v530_v55, 5  ;;  %v2594_v53 = vld [vmem:[%s2407_s30 + $0x88] sm:$0xf] }
  0x39   : > { %v536_v17 = vshll.u32 %v2528_v39, 16  ;;  %v542_v18 = vrot.slane %v540_v56, 4  ;;  %v546_v19 = vshll.u32 %v261_v60, 16  ;;  %v337_v23 = vrot.slane %v335_v62, 4 }
  0x3a   : > { %v496_v21 = vrot.slane %v495_v8, 4  ;;  %v340_v26 = vrot.slane %v338_v63, 5  ;;  %v344_v25 = vshll.u32 %v2540_v50, 16  ;;  %v533_v27 = vor.u32 %v532_v13, %v529_v11  ;;  %v2624_v13 = vld [vmem:[%s2407_s30 + $0x24] sm:$0xf] }
  0x3b   : > { %v538_v28 = vrot.slane %v536_v17, 5  ;;  %v350_v0 = vrot.slane %v348_v2, 4  ;;  %v354_v32 = vshll.u32 %v2564_v20, 16  ;;  %v548_v34 = vrot.slane %v546_v19, 5  ;;  %v2627_v17 = vld [vmem:[%s2407_s30 + $0x28] sm:$0xf] }
  0x3c   : > { %v501_v6 = vsel %vm2484_vm5, %v496_v21, %v500_v61  ;;  %1130 = vrot.lane.b32.xlu1 %v2560_v9, %s2317_s4  ;;  %v341_v29 = vor.u32 %v340_v26, %v337_v23  ;;  %v346_v30 = vrot.slane %v344_v25, 5  ;;  %v534_v33 = vrot.slane %v533_v27, 4  ;;  %v2630_v23 = vld [vmem:[%s2407_s30 + $0x8c] sm:$0x1] }
  0x3d   : > { %v2572_v1 = vcombine.low %v491_v7, %v501_v6  ;;  %v543_v3 = vor.u32 %v542_v18, %v538_v28  ;;  %v793_v36 = vrot.slane %v2528_v39, 5  ;;  %v2579_v37 = vcombine.low %v2537_v49, %v2540_v50 }
  0x3e   : > { %v351_v31 = vor.u32 %v350_v0, %v346_v30  ;;  %v539_v38 = vsel %vm2484_vm5, %v534_v33, %v538_v28  ;;  %v342_v42 = vrot.slane %v341_v29, 4  ;;  %v356_v44 = vrot.slane %v354_v32, 5 }
  0x3f   : > { %1013 = vrot.lane.b32.xlu0 %v2572_v1, %s2319_s6  ;;  %v544_v40 = vrot.slane %v543_v3, 4  ;;  %v1998_v39 = vrot.slane %v2523_v35, 9  ;;  %v795_v46 = vrot.slane %v793_v36, 4  ;;  %v796_v47 = vrot.slane %v261_v60, 5 }
  0x40   : > { %1163 = vrot.lane.b32.xlu1 %v2548_v57, %s2320_s7  ;;  %v352_v43 = vrot.slane %v351_v31, 4  ;;  %v347_v35 = vsel %vm2484_vm5, %v342_v42, %v346_v30  ;;  %v737_v59 = vrot.slane %v2540_v50, 5  ;;  %v551_v60 = vshrl.u32 %v2591_v52, 16  ;;  %v240_v42 = vld [vmem:[%s2407_s30 + $0x2c] sm:$0x1] }
  0x41   : > { %v549_v45 = vsel %vm2484_vm5, %v544_v40, %v548_v34  ;;  %v794_v56 = vsel %vm2439_vm4, %v1998_v39, %v793_v36  ;;  %v797_v15 = vsel %vm2439_vm4, %v795_v46, %v796_v47  ;;  %v554_v61 = vshll.u32 %v2591_v52, 16  ;;  %v2230_v46 = vld [vmem:[%s3636_s1] sm:$0xff]  }
  0x42   : > { %v2588_v48 = vcombine.low %v539_v38, %v549_v45  ;;  %v357_v55 = vsel %vm2484_vm5, %v352_v43, %v356_v44  ;;  %v564_v62 = vshrl.u32 %v2594_v53, 16  ;;  %v560_v63 = vshll.u32 %v2594_v53, 16  ;;  %2105 = vmatprep.subr.bf16.mxu0 %v2230_v46  ;;  %2143 = vmatprep.subr.bf16.mxu1 %v2230_v46 }
  0x43   : > { %1114 = vrot.lane.b32.xlu0 %v2579_v37, %s2317_s4  ;;  %v2615_v2 = vcombine.low %v347_v35, %v357_v55  ;;  %v1990_v7 = vrot.slane %v2537_v49, 9  ;;  %v2620_v50 = vcombine.low %v794_v56, %v797_v15  ;;  %v739_v8 = vrot.slane %v737_v59, 4  ;;  %2106 = vmatpush3.bf16.msra.mxu0 %v2230_v46 }
  0x44   : > { %1165 = vrot.lane.b32.xlu1 %v2588_v48, %s2320_s7  ;;  %v740_v11 = vrot.slane %v2564_v20, 5  ;;  %v553_v18 = vrot.slane %v551_v60, 4  ;;  %v556_v19 = vrot.slane %v554_v61, 5  ;;  %v566_v21 = vrot.slane %v564_v62, 4  ;;  %2146 = vmatpush3.bf16.msra.mxu1 %v2230_v46  ;;  %v2231_v60 = vld [vmem:[%s3636_s1 + $0x8] sm:$0xff]  }
  0x45   : > { %v738_v49 = vsel %vm2439_vm4, %v1990_v7, %v737_v59  ;;  %v359_v26 = vshrl.u32 %v2624_v13, 16  ;;  %v362_v25 = vshll.u32 %v2624_v13, 16  ;;  %v372_v27 = vshrl.u32 %v2627_v17, 16  ;;  %2107 = vmatprep.subr.bf16.mxu0 %v2231_v60  ;;  %2144 = vmatprep.subr.bf16.mxu1 %v2231_v60 }
  0x46   : > { %v741_v20 = vsel %vm2439_vm4, %v739_v8, %v740_v11  ;;  %v368_v28 = vshll.u32 %v2627_v17, 16  ;;  %v557_v0 = vor.u32 %v556_v19, %v553_v18  ;;  %v570_v29 = vshll.u32 %v2630_v23, 16 }
  0x47   : > { %1147 = vrot.lane.b32.xlu0 %v2514_v5, %s2320_s7  ;;  %v562_v5 = vrot.slane %v560_v63, 5  ;;  %v2647_v30 = vcombine.low %v738_v49, %v741_v20  ;;  %v2651_v32 = vcombine.low %v2591_v52, %v2594_v53  ;;  %v361_v33 = vrot.slane %v359_v26, 4  ;;  %2108 = vmatpush3.bf16.msra.mxu0 %v2231_v60  ;;  %v2718_v49 = vld [vmem:[%s2407_s30 + $0x90] sm:$0xf]  ;;  %v2721_v26 = vld [vmem:[%s2407_s30 + $0x94] sm:$0xf] }
  0x48   : > { %1198 = vrot.lane.b32.xlu1 %v2488_v54, %s2321_s8  ;;  %v364_v3 = vrot.slane %v362_v25, 5  ;;  %v370_v34 = vrot.slane %v368_v28, 5  ;;  %v374_v31 = vrot.slane %v372_v27, 4  ;;  %v558_v36 = vrot.slane %v557_v0, 4  ;;  %2147 = vmatpush3.bf16.msra.mxu1 %v2231_v60  ;;  %v2741_v0 = vld [vmem:[%s2407_s30 + $0x34] sm:$0xf] }
  0x49   : > { %v567_v6 = vor.u32 %v566_v21, %v562_v5  ;;  %v572_v40 = vrot.slane %v570_v29, 5  ;;  %v378_v44 = vshll.u32 %v240_v42, 16  ;;  %v2671_v47 = vcombine.low %v2624_v13, %v2627_v17  ;;  %v243_v60 = vld [vmem:[%s2407_s30 + $0x38] sm:$0x1] }
  0x4a   : > { %v375_v43 = vor.u32 %v374_v31, %v370_v34  ;;  %v563_v39 = vsel %vm2484_vm5, %v558_v36, %v562_v5  ;;  %v800_v15 = vrot.slane %v2594_v53, 5  ;;  %v1999_v53 = vrot.slane %v2591_v52, 9 }
  0x4b   : > { %1149 = vrot.lane.b32.xlu0 %v2615_v2, %s2320_s7  ;;  %v568_v38 = vrot.slane %v567_v6, 4  ;;  %3654 = vst [vmem:[#allocation7_spill] sm:$0xff] %v2671_v47  ;;  %v380_v59 = vrot.slane %v378_v44, 5  ;;  %v803_v7 = vrot.slane %v2630_v23, 5  ;;  %v744_v11 = vrot.slane %v2627_v17, 5 }
  0x4c   : > { %1200 = vrot.lane.b32.xlu1 %v2620_v50, %s2321_s8  ;;  %v376_v56 = vrot.slane %v375_v43, 4  ;;  %v802_v63 = vrot.slane %v800_v15, 4  ;;  %v801_v52 = vsel %vm2439_vm4, %v1999_v53, %v800_v15  ;;  %v1991_v5 = vrot.slane %v2624_v13, 9  ;;  %v2234_v44 = vld [vmem:[%s3636_s1 + $0x10] ss:$0 sps:$4 sm:$0x33]  }
  0x4d   : > { %v573_v45 = vsel %vm2484_vm5, %v568_v38, %v572_v40  ;;  %v746_v21 = vrot.slane %v744_v11, 4  ;;  %v747_v23 = vrot.slane %v240_v42, 5  ;;  %v575_v20 = vshrl.u32 %v2718_v49, 16  ;;  %2149 = vmatprep.subr.msk.bf16.mxu0 %vm1659_vm6, %v2234_v44  ;;  %2150 = vmatprep.subr.msk.bf16.mxu1 %vm1659_vm6, %v2234_v44 }
  0x4e   : > { %v2675_v35 = vcombine.low %v563_v39, %v573_v45  ;;  %v381_v62 = vsel %vm2484_vm5, %v376_v56, %v380_v59  ;;  %v804_v18 = vsel %vm2439_vm4, %v802_v63, %v803_v7  ;;  %v745_v17 = vsel %vm2439_vm4, %v1991_v5, %v744_v11 }
  0x4f   : > { %1182 = vrot.lane.b32.xlu0 %v2494_v58, %s2321_s8  ;;  %v365_v58 = vor.u32 %v364_v3, %v361_v33  ;;  %v2706_v19 = vcombine.low %v801_v52, %v804_v18  ;;  %v578_v25 = vshll.u32 %v2718_v49, 16  ;;  %v588_v27 = vshrl.u32 %v2721_v26, 16 }
  0x50   : > { %1233 = vrot.lane.b32.xlu1 %v2560_v9, %s2322_s9  ;;  %v584_v28 = vshll.u32 %v2721_v26, 16  ;;  %v577_v6 = vrot.slane %v575_v20, 4  ;;  %v392_v38 = vshll.u32 %v2741_v0, 16  ;;  %v2756_v43 = vcombine.low %v2718_v49, %v2721_v26  ;;  %v2785_v20 = vld [vmem:[%s2407_s30 + $0x9c] sm:$0xf] }
  0x51   : > { %v366_v55 = vrot.slane %v365_v58, 4  ;;  %v580_v29 = vrot.slane %v578_v25, 5  ;;  %v590_v3 = vrot.slane %v588_v27, 4  ;;  %v402_v53 = vshll.u32 %v243_v60, 16  ;;  %v2788_v25 = vld [vmem:[%s2407_s30 + $0xa0] sm:$0xf] }
  0x52   : > { %v586_v33 = vrot.slane %v584_v28, 5  ;;  %3655 = vst [vmem:[#allocation8_spill] sm:$0xff] %v2756_v43  ;;  %v394_v46 = vrot.slane %v392_v38, 5  ;;  %v807_v11 = vrot.slane %v2721_v26, 5  ;;  %v2000_v18 = vrot.slane %v2718_v49, 9 }
  0x53   : > { %1184 = vrot.lane.b32.xlu0 %v2647_v30, %s2321_s8  ;;  %v371_v61 = vsel %vm2484_vm5, %v366_v55, %v370_v34  ;;  %v267_v34 = vld [vmem:[%s2407_s30 + $0x98] sm:$0x1]  ;;  %v581_v40 = vor.u32 %v580_v29, %v577_v6  ;;  %v751_v27 = vrot.slane %v2741_v0, 5  ;;  %v599_v6 = vshrl.u32 %v2785_v20, 16 }
  0x54   : > { %1235 = vrot.lane.b32.xlu1 %v2651_v32, %s2322_s9  ;;  %v2693_v8 = vcombine.low %v371_v61, %v381_v62  ;;  %v591_v42 = vor.u32 %v590_v3, %v586_v33  ;;  %v594_v58 = vshll.u32 %v267_v34, 16  ;;  %v810_v26 = vrot.slane %v267_v34, 5 }
  0x55   : > { %v582_v56 = vrot.slane %v581_v40, 4  ;;  %v808_v28 = vsel %vm2439_vm4, %v2000_v18, %v807_v11  ;;  %v608_v3 = vshll.u32 %v2788_v25, 16  ;;  %v2817_v40 = vld [vmem:[%s2407_s30 + $0x3c] sm:$0xf] }
  0x56   : > { %v592_v59 = vrot.slane %v591_v42, 4  ;;  %v596_v15 = vrot.slane %v594_v58, 5  ;;  %v2820_v42 = vld [vmem:[%s2407_s30 + $0x40] sm:$0xf]  ;;  %v601_v58 = vrot.slane %v599_v6, 4 }
  0x57   : > { %1217 = vrot.lane.b32.xlu0 %v2579_v37, %s2322_s9  ;;  %v587_v63 = vsel %vm2484_vm5, %v582_v56, %v586_v33  ;;  %v612_v33 = vshrl.u32 %v2788_v25, 16  ;;  %v420_v56 = vshrl.u32 %v2820_v42, 16 }
  0x58   : > { %1268 = vrot.lane.b32.xlu1 %v2588_v48, %s2323_s18  ;;  %v597_v7 = vsel %vm2484_vm5, %v592_v59, %v596_v15  ;;  %v416_v59 = vshll.u32 %v2820_v42, 16 }
  0x59   : > { %v2782_v5 = vcombine.low %v587_v63, %v597_v7 }
  0x5a   : > { %v418_v7 = vrot.slane %v416_v59, 5 }
  0x5b   : > { %1219 = vrot.lane.b32.xlu0 %v2671_v47, %s2322_s9 }
  0x5c   : > { %1270 = vrot.lane.b32.xlu1 %v2675_v35, %s2323_s18 }
  0x5f   : > { %1252 = vrot.lane.b32.xlu0 %v2615_v2, %s2323_s18 }
  0x60   : > { %1303 = vrot.lane.b32.xlu1 %v2620_v50, %s2324_s23 }
  0x63   : > { %1254 = vrot.lane.b32.xlu0 %v2693_v8, %s2323_s18 }
  0x64   : > { %1017 = vrot.lane.b32.xlu1 %v2588_v48, %s2319_s6  ;;  %v748_v48 = vsel %vm2439_vm4, %v746_v21, %v747_v23 }
  0x65   : > { %v2725_v13 = vcombine.low %v745_v17, %v748_v48  ;;  %v404_v17 = vrot.slane %v402_v53, 5  ;;  %v809_v48 = vrot.slane %v807_v11, 4  ;;  %v422_v11 = vrot.slane %v420_v56, 4 }
  0x67   : > { %1287 = vrot.lane.b32.xlu0 %v2647_v30, %s2324_s23  ;;  %v811_v29 = vsel %vm2439_vm4, %v809_v48, %v810_v26  ;;  %v423_v26 = vor.u32 %v422_v11, %v418_v7 }
  0x68   : > { %1305 = vrot.lane.b32.xlu1 %v2706_v19, %s2324_s23  ;;  %v2814_v38 = vcombine.low %v808_v28, %v811_v29  ;;  %v2860_v28 = vcombine.low %v2817_v40, %v2820_v42 }
  0x6a   : > { %3658 = vst [vmem:[#allocation11_spill] sm:$0xff] %v2860_v28 }
  0x6b   : > { %1001 = vrot.lane.b32.xlu0 %v2615_v2, %s2319_s6  ;;  %v2738_v2 = vld [vmem:[%s2407_s30 + $0x30] sm:$0xf] }
  0x6c   : > { %1019 = vrot.lane.b32.xlu1 %v2675_v35, %s2319_s6  ;;  %v383_v31 = vshrl.u32 %v2738_v2, 16  ;;  %v386_v36 = vshll.u32 %v2738_v2, 16  ;;  %v2777_v52 = vcombine.low %v2738_v2, %v2741_v0 }
  0x6e   : > { %v385_v39 = vrot.slane %v383_v31, 4  ;;  %v388_v45 = vrot.slane %v386_v36, 5  ;;  %3656 = vst [vmem:[#allocation9_spill] sm:$0xff] %v2777_v52  ;;  %v1992_v31 = vrot.slane %v2738_v2, 9  ;;  %v753_v36 = vrot.slane %v751_v27, 4 }
  0x6f   : > { %1289 = vrot.lane.b32.xlu0 %v2725_v13, %s2324_s23 }
  0x70   : > { %1097 = vrot.lane.b32.xlu1 %v2620_v50, %s2318_s5  ;;  %v396_v50 = vshrl.u32 %v2741_v0, 16  ;;  %v389_v61 = vor.u32 %v388_v45, %v385_v39  ;;  %v602_v0 = vshll.u32 %v2785_v20, 16  ;;  %v610_v39 = vrot.slane %v608_v3, 5 }
  0x71   : > { %v614_v45 = vrot.slane %v612_v33, 4  ;;  %v752_v2 = vsel %vm2439_vm4, %v1992_v31, %v751_v27  ;;  %v814_v31 = vrot.slane %v2788_v25, 5 }
  0x72   : > { %v398_v55 = vrot.slane %v396_v50, 4  ;;  %v390_v21 = vrot.slane %v389_v61, 4  ;;  %v754_v50 = vrot.slane %v243_v60, 5 }
  0x73   : > { %1003 = vrot.lane.b32.xlu0 %v2693_v8, %s2319_s6  ;;  %v615_v60 = vor.u32 %v614_v45, %v610_v39 }
  0x74   : > { %1099 = vrot.lane.b32.xlu1 %v2706_v19, %s2318_s5  ;;  %v399_v62 = vor.u32 %v398_v55, %v394_v46  ;;  %v410_v55 = vshll.u32 %v2817_v40, 16 }
  0x76   : > { %v400_v23 = vrot.slane %v399_v62, 4  ;;  %v2841_v62 = vcombine.low %v2785_v20, %v2788_v25  ;;  %v412_v63 = vrot.slane %v410_v55, 5 }
  0x77   : > { %1081 = vrot.lane.b32.xlu0 %v2647_v30, %s2318_s5  ;;  %v1661_v30 = vsel %vm1659_vm6, %v2234_v44, 0  ;;  %v604_v44 = vrot.slane %v602_v0, 5  ;;  %v424_v0 = vrot.slane %v423_v26, 4 }
  0x78   : > { %1132 = vrot.lane.b32.xlu1 %v2651_v32, %s2317_s4  ;;  %2110 = vmatpush3.bf16.msra.mxu0 %v1661_v30  ;;  %v405_v49 = vsel %vm2484_vm5, %v400_v23, %v404_v17  ;;  %3657 = vst [vmem:[#allocation10_spill] sm:$0xff] %v2841_v62  ;;  %v246_v17 = vld [vmem:[%s2407_s30 + $0x44] sm:$0x1] }
  0x79   : > { %2148 = vmatpush3.bf16.msra.mxu1 %v1661_v30  ;;  %v605_v15 = vor.u32 %v604_v44, %v601_v58  ;;  %v426_v27 = vshll.u32 %v246_v17, 16  ;;  %v2001_v44 = vrot.slane %v2785_v20, 9 }
  0x7b   : > { %1083 = vrot.lane.b32.xlu0 %v2725_v13, %s2318_s5  ;;  %v606_v18 = vrot.slane %v605_v15, 4  ;;  %v428_v33 = vrot.slane %v426_v27, 5  ;;  %v815_v20 = vsel %vm2439_vm4, %v2001_v44, %v814_v31  ;;  %v761_v15 = vrot.slane %v246_v17, 5  ;;  %v2946_v27 = vld [vmem:[%s2407_s30 + $0x4c] sm:$0xf] }
  0x7c   : > { %1134 = vrot.lane.b32.xlu1 %v2756_v43, %s2317_s4  ;;  %v440_v44 = vshll.u32 %v2946_v27, 16 }
  0x7d   : > { %v429_v58 = vsel %vm2484_vm5, %v424_v0, %v428_v33 }
  0x7f   : > { %1116 = vrot.lane.b32.xlu0 %v2671_v47, %s2317_s4 }
  0x80   : > { %1167 = vrot.lane.b32.xlu1 %v2675_v35, %s2320_s7  ;;  %v395_v35 = vsel %vm2484_vm5, %v390_v21, %v394_v46  ;;  %v407_v46 = vshrl.u32 %v2817_v40, 16  ;;  %v616_v21 = vrot.slane %v615_v60, 4 }
  0x81   : > { %v2809_v34 = vcombine.low %v395_v35, %v405_v49  ;;  %v611_v35 = vsel %vm2484_vm5, %v606_v18, %v610_v39  ;;  %v816_v39 = vrot.slane %v814_v31, 4  ;;  %v273_v31 = vld [vmem:[%s2407_s30 + $0xb0] sm:$0x1] }
  0x82   : > { %v409_v53 = vrot.slane %v407_v46, 4  ;;  %v758_v46 = vrot.slane %v2820_v42, 5  ;;  %v1993_v42 = vrot.slane %v2817_v40, 9  ;;  %v2917_v40 = vld [vmem:[%s2407_s30 + $0xa8] sm:$0xf] }
  0x83   : > { %1118 = vrot.lane.b32.xlu0 %v2777_v52, %s2317_s4  ;;  %v623_v18 = vshrl.u32 %v2917_v40, 16 }
  0x84   : > { %1169 = vrot.lane.b32.xlu1 %v2782_v5, %s2320_s7  ;;  %v413_v48 = vor.u32 %v412_v63, %v409_v53  ;;  %v760_v59 = vrot.slane %v758_v46, 4  ;;  %v2920_v63 = vld [vmem:[%s2407_s30 + $0xac] sm:$0xf] }
  0x85   : > { %v632_v17 = vshll.u32 %v2920_v63, 16 }
  0x86   : > { %v414_v29 = vrot.slane %v413_v48, 4 }
  0x87   : > { %1151 = vrot.lane.b32.xlu0 %v2693_v8, %s2320_s7  ;;  %v270_v8 = vld [vmem:[%s2407_s30 + $0xa4] sm:$0x1] }
  0x88   : > { %1202 = vrot.lane.b32.xlu1 %v2706_v19, %s2321_s8  ;;  %v755_v19 = vsel %vm2439_vm4, %v753_v36, %v754_v50  ;;  %v618_v30 = vshll.u32 %v270_v8, 16  ;;  %v419_v50 = vsel %vm2484_vm5, %v414_v29, %v418_v7  ;;  %v817_v45 = vrot.slane %v270_v8, 5 }
  0x89   : > { %v2837_v61 = vcombine.low %v752_v2, %v755_v19  ;;  %v2884_v25 = vcombine.low %v419_v50, %v429_v58  ;;  %v634_v29 = vrot.slane %v632_v17, 5  ;;  %v444_v58 = vshrl.u32 %v2946_v27, 16 }
  0x8a   : > { %v620_v23 = vrot.slane %v618_v30, 5  ;;  %v818_v8 = vsel %vm2439_vm4, %v816_v39, %v817_v45  ;;  %v759_v30 = vsel %vm2439_vm4, %v1993_v42, %v758_v46  ;;  %v2967_v42 = vcombine.low %v2917_v40, %v2920_v63 }
  0x8b   : > { %1153 = vrot.lane.b32.xlu0 %v2809_v34, %s2320_s7  ;;  %v2901_v56 = vcombine.low %v815_v20, %v818_v8  ;;  %v642_v20 = vshll.u32 %v273_v31, 16 }
  0x8c   : > { %1204 = vrot.lane.b32.xlu1 %v2814_v38, %s2321_s8  ;;  %v621_v49 = vsel %vm2484_vm5, %v616_v21, %v620_v23  ;;  %v626_v21 = vshll.u32 %v2917_v40, 16  ;;  %v636_v23 = vshrl.u32 %v2920_v63, 16 }
  0x8d   : > { %v2864_v6 = vcombine.low %v611_v35, %v621_v49  ;;  %v625_v35 = vrot.slane %v623_v18, 4  ;;  %v644_v17 = vrot.slane %v642_v20, 5 }
  0x8e   : > { %v628_v49 = vrot.slane %v626_v21, 5  ;;  %v638_v0 = vrot.slane %v636_v23, 4 }
  0x8f   : > { %1186 = vrot.lane.b32.xlu0 %v2725_v13, %s2321_s8 }
  0x90   : > { %1237 = vrot.lane.b32.xlu1 %v2756_v43, %s2322_s9  ;;  %v629_v45 = vor.u32 %v628_v49, %v625_v35  ;;  %v639_v46 = vor.u32 %v638_v0, %v634_v29  ;;  %v2974_v35 = vld [vmem:[%s2407_s30 + $0x50] sm:$0x1] }
  0x92   : > { %v2850_v13 = vpop.permute.xlu1 %1128  ;;  %v630_v21 = vrot.slane %v629_v45, 4  ;;  %v640_v23 = vrot.slane %v639_v46, 4  ;;  %v821_v45 = vrot.slane %v2920_v63, 5 }
  0x93   : > { %1188 = vrot.lane.b32.xlu0 %v2837_v61, %s2321_s8 }
  0x94   : > { %1239 = vrot.lane.b32.xlu1 %v2841_v62, %s2322_s9  ;;  %v2866_v3 = vpop.permute.xlu0 %1112 }
  0x97   : > { %1221 = vrot.lane.b32.xlu0 %v2777_v52, %s2322_s9  ;;  %v3011_v52 = vld [vmem:[%s2407_s30 + $0xb8] sm:$0xf] }
  0x98   : > { %1272 = vrot.lane.b32.xlu1 %v2782_v5, %s2323_s18 }
  0x9a   : > { %v2869_v36 = vpop.permute.xlu1 %1093 }
  0x9b   : > { %1223 = vrot.lane.b32.xlu0 %v2860_v28, %s2322_s9 }
  0x9c   : > { %1274 = vrot.lane.b32.xlu1 %v2864_v6, %s2323_s18  ;;  %v2886_v19 = vpop.permute.xlu0 %1077 }
  0x9e   : > { %v2880_v2 = vpop.permute.xlu1 %1095 }
  0x9f   : > { %1256 = vrot.lane.b32.xlu0 %v2809_v34, %s2323_s18 }
  0xa0   : > { %1307 = vrot.lane.b32.xlu1 %v2814_v38, %s2324_s23  ;;  %v2904_v60 = vpop.permute.xlu0 %1079 }
  0xa3   : > { %1258 = vrot.lane.b32.xlu0 %v2884_v25, %s2323_s18  ;;  %v2899_v55 = vpop.permute.xlu1 %999 }
  0xa4   : > { %1021 = vrot.lane.b32.xlu1 %v2782_v5, %s2319_s6  ;;  %v762_v5 = vsel %vm2439_vm4, %v760_v59, %v761_v15 }
  0xa5   : > { %v2926_v11 = vcombine.low %v759_v30, %v762_v5  ;;  %v442_v30 = vrot.slane %v440_v44, 5  ;;  %v446_v5 = vrot.slane %v444_v58, 4  ;;  %v635_v58 = vsel %vm2484_vm5, %v630_v21, %v634_v29 }
  0xa6   : > { %v645_v44 = vsel %vm2484_vm5, %v640_v23, %v644_v17  ;;  %v823_v23 = vrot.slane %v821_v45, 4  ;;  %v824_v17 = vrot.slane %v273_v31, 5 }
  0xa7   : > { %1291 = vrot.lane.b32.xlu0 %v2837_v61, %s2324_s23  ;;  %v447_v0 = vor.u32 %v446_v5, %v442_v30  ;;  %v3001_v29 = vcombine.low %v635_v58, %v645_v44  ;;  %v660_v58 = vshrl.u32 %v3011_v52, 16 }
  0xa8   : > { %1309 = vrot.lane.b32.xlu1 %v2901_v56, %s2324_s23  ;;  %v2924_v7 = vpop.permute.xlu0 %997 }
  0xa9   : > { %v448_v5 = vrot.slane %v447_v0, 4 }
  0xaa   : > { %v2914_v53 = vpop.permute.xlu1 %1015 }
  0xab   : > { %1005 = vrot.lane.b32.xlu0 %v2809_v34, %s2319_s6  ;;  %v2941_v34 = vld [vmem:[%s2407_s30 + $0x48] sm:$0xf] }
  0xac   : > { %1023 = vrot.lane.b32.xlu1 %v2864_v6, %s2319_s6  ;;  %v434_v50 = vshll.u32 %v2941_v34, 16  ;;  %v2996_v20 = vcombine.low %v2941_v34, %v2946_v27 }
  0xae   : > { %v2934_v48 = vpop.permute.xlu1 %1130  ;;  %v436_v15 = vrot.slane %v434_v50, 5 }
  0xaf   : > { %1293 = vrot.lane.b32.xlu0 %v2926_v11, %s2324_s23 }
  0xb0   : > { %1101 = vrot.lane.b32.xlu1 %v2814_v38, %s2318_s5  ;;  %v431_v38 = vshrl.u32 %v2941_v34, 16 }
  0xb1   : > { %v2943_v26 = vpop.permute.xlu0 %1013 }
  0xb2   : > { %v2948_v33 = vpop.permute.xlu1 %1163  ;;  %v433_v59 = vrot.slane %v431_v38, 4  ;;  %v450_v38 = vshll.u32 %v2974_v35, 16 }
  0xb3   : > { %1007 = vrot.lane.b32.xlu0 %v2884_v25, %s2319_s6 }
  0xb4   : > { %1103 = vrot.lane.b32.xlu1 %v2901_v56, %s2318_s5  ;;  %v452_v21 = vrot.slane %v450_v38, 5 }
  0xb5   : > { %v2959_v39 = vpop.permute.xlu0 %1114 }
  0xb6   : > { %v2961_v8 = vpop.permute.xlu1 %1165 }
  0xb7   : > { %1085 = vrot.lane.b32.xlu0 %v2837_v61, %s2318_s5  ;;  %v437_v61 = vor.u32 %v436_v15, %v433_v59  ;;  %v2002_v59 = vrot.slane %v2917_v40, 9  ;;  %v3015_v40 = vcombine.low %v2427_v12, %v2432_v14 }
  0xb8   : > { %1136 = vrot.lane.b32.xlu1 %v2841_v62, %s2317_s4  ;;  %v3006_v62 = vld [vmem:[%s2407_s30 + $0xb4] sm:$0xf] }
  0xb9   : > { %v2971_v18 = vpop.permute.xlu0 %1147  ;;  %v438_v15 = vrot.slane %v437_v61, 4  ;;  %v453_v61 = vsel %vm2484_vm5, %v448_v5, %v452_v21  ;;  %v822_v0 = vsel %vm2439_vm4, %v2002_v59, %v821_v45  ;;  %v647_v12 = vshrl.u32 %v3006_v62, 16 }
  0xba   : > { %v2976_v49 = vpop.permute.xlu1 %1198  ;;  %v650_v38 = vshll.u32 %v3006_v62, 16  ;;  %v768_v5 = vrot.slane %v2974_v35, 5  ;;  %v2006_v21 = vcombine.low %v2449_v22, %v2452_v24  ;;  %v662_v22 = vrot.slane %v660_v58, 4 }
  0xbb   : > { %1087 = vrot.lane.b32.xlu0 %v2926_v11, %s2318_s5  ;;  %v443_v31 = vsel %vm2484_vm5, %v438_v15, %v442_v30  ;;  %v656_v30 = vshll.u32 %v3011_v52, 16  ;;  %v1994_v15 = vrot.slane %v2941_v34, 9  ;;  %v649_v35 = vrot.slane %v647_v12, 4 }
  0xbc   : > { %1138 = vrot.lane.b32.xlu1 %v2967_v42, %s2317_s4  ;;  %v3041_v45 = vcombine.low %v443_v31, %v453_v61  ;;  %v3059_v31 = vld [vmem:[%s2407_s30 + $0x58] sm:$0xf]  ;;  %v652_v61 = vrot.slane %v650_v38, 5  ;;  %v3090_v57 = vcombine.low %v3006_v62, %v3011_v52  ;;  %v1322_v47 = vsel %vm1319_vm7, %v2006_v21, %v2924_v7 }
  0xbd   : > { %v2983_v50 = vpop.permute.xlu0 %1149  ;;  %v3061_v43 = vrot.slane %v656_v30, 5  ;;  %v464_v58 = vshll.u32 %v3059_v31, 16 }
  0xbe   : > { %v2990_v46 = vpop.permute.xlu1 %1200  ;;  %v653_v30 = vor.u32 %v652_v61, %v649_v35 }
  0xbf   : > { %1120 = vrot.lane.b32.xlu0 %v2860_v28, %s2317_s4 }
  0xc0   : > { %1171 = vrot.lane.b32.xlu1 %v2864_v6, %s2320_s7  ;;  %v765_v6 = vrot.slane %v2946_v27, 5  ;;  %v825_v27 = vsel %vm2439_vm4, %v823_v23, %v824_v17  ;;  %v1346_v23 = vsel %vm1319_vm7, %v3015_v40, %v2943_v26  ;;  %v3054_v17 = vld [vmem:[%s2407_s30 + $0x54] sm:$0xf]  ;;  %v3066_v26 = vld [vmem:[%s2407_s30 + $0xbc] sm:$0x1] }
  0xc1   : > { %v3003_v63 = vpop.permute.xlu0 %1182  ;;  %v3051_v34 = vcombine.low %v822_v0, %v825_v27  ;;  %v1386_v0 = vsel %vm1368_vm8, %v1346_v23, %v2869_v36  ;;  %v455_v27 = vshrl.u32 %v3054_v17, 16  ;;  %v458_v38 = vshll.u32 %v3054_v17, 16 }
  0xc2   : > { %v3008_v28 = vpop.permute.xlu1 %1233  ;;  %v767_v59 = vrot.slane %v765_v6, 4 }
  0xc3   : > { %1122 = vrot.lane.b32.xlu0 %v2996_v20, %s2317_s4  ;;  %v457_v61 = vrot.slane %v455_v27, 4 }
  0xc4   : > { %1173 = vrot.lane.b32.xlu1 %v3001_v29, %s2320_s7  ;;  %v769_v12 = vsel %vm2439_vm4, %v767_v59, %v768_v5  ;;  %v666_v59 = vshll.u32 %v3066_v26, 16  ;;  %v1419_v5 = vsel %vm1401_vm9, %v1386_v0, %v2850_v13  ;;  %v3105_v0 = vrot.slane %v464_v58, 5 }
  0xc5   : > { %v3029_v14 = vpop.permute.xlu0 %1184  ;;  %v1452_v35 = vsel %vm1434_vm10, %v1419_v5, %v2948_v33 }
  0xc6   : > { %v3036_v44 = vpop.permute.xlu1 %1235  ;;  %v1485_v13 = vsel %vm1467_vm11, %v1452_v35, %v2976_v49  ;;  %v668_v27 = vrot.slane %v666_v59, 5  ;;  %v1349_v49 = vsel %vm1319_vm7, %v2419_v4, %v2914_v53 }
  0xc7   : > { %1155 = vrot.lane.b32.xlu0 %v2884_v25, %s2320_s7  ;;  %v1518_v33 = vsel %vm1500_vm12, %v1485_v13, %v3008_v28 }
  0xc8   : > { %1206 = vrot.lane.b32.xlu1 %v2901_v56, %s2321_s8  ;;  %v766_v56 = vsel %vm2439_vm4, %v1994_v15, %v765_v6  ;;  %v468_v6 = vshrl.u32 %v3059_v31, 16  ;;  %v663_v15 = vor.u32 %v662_v22, %v3061_v43  ;;  %v460_v22 = vrot.slane %v458_v38, 5 }
  0xc9   : > { %v3056_v25 = vpop.permute.xlu0 %1217  ;;  %v3086_v23 = vcombine.low %v766_v56, %v769_v12  ;;  %v3103_v56 = vld [vmem:[%s2407_s30 + $0x5c] sm:$0x1]  ;;  %v654_v12 = vrot.slane %v653_v30, 4  ;;  %v1370_v38 = vsel %vm1368_vm8, %v1322_v47, %v2886_v19  ;;  %v1388_v19 = vsel %vm1368_vm8, %v1349_v49, %v2880_v2 }
  0xca   : > { %v1269_v24 = vpop.permute.xlu1 %1268  ;;  %v470_v7 = vrot.slane %v468_v6, 4  ;;  %v461_v28 = vor.u32 %v460_v22, %v457_v61  ;;  %v474_v58 = vshll.u32 %v3103_v56, 16  ;;  %v1403_v53 = vsel %vm1401_vm9, %v1370_v38, %v2866_v3 }
  0xcb   : > { %1157 = vrot.lane.b32.xlu0 %v3041_v45, %s2320_s7  ;;  %v1551_v5 = vsel %vm1533_vm13, %v1518_v33, %v1269_v24  ;;  %v659_v30 = vsel %vm2484_vm5, %v654_v12, %v3061_v43  ;;  %v1421_v59 = vsel %vm1401_vm9, %v1388_v19, %v2934_v48  ;;  %v1436_v61 = vsel %vm1434_vm10, %v1403_v53, %v2971_v18 }
  0xcc   : > { %1208 = vrot.lane.b32.xlu1 %v3051_v34, %s2321_s8  ;;  %v471_v47 = vor.u32 %v470_v7, %v3105_v0  ;;  %v3138_v2 = vcombine.low %v3054_v17, %v3059_v31  ;;  %v1454_v3 = vsel %vm1434_vm10, %v1421_v59, %v2961_v8  ;;  %v1469_v43 = vsel %vm1467_vm11, %v1436_v61, %v3003_v63 }
  0xcd   : > { %v3080_v36 = vpop.permute.xlu0 %1219  ;;  %v462_v13 = vrot.slane %v461_v28, 4  ;;  %v476_v48 = vrot.slane %v474_v58, 5  ;;  %v1487_v18 = vsel %vm1467_vm11, %v1454_v3, %v2990_v46  ;;  %v1502_v7 = vsel %vm1500_vm12, %v1469_v43, %v3056_v25  ;;  %v278_v43 = vld [vmem:[%s2407_s30 + $0xc4] sm:$0xf] }
  0xce   : > { %v1271_v54 = vpop.permute.xlu1 %1270  ;;  %v472_v8 = vrot.slane %v471_v47, 4  ;;  %v1325_v63 = vsel %vm1319_vm7, %v2424_v10, %v2899_v55  ;;  %v1520_v12 = vsel %vm1500_vm12, %v1487_v18, %v3036_v44  ;;  %v828_v46 = vrot.slane %v3011_v52, 5 }
  0xcf   : > { %1190 = vrot.lane.b32.xlu0 %v2926_v11, %s2321_s8  ;;  %v664_v11 = vrot.slane %v663_v15, 4  ;;  %v1553_v25 = vsel %vm1533_vm13, %v1520_v12, %v1271_v54  ;;  %v1372_v55 = vsel %vm1368_vm8, %v1325_v63, %v2904_v60  ;;  %v467_v54 = vsel %vm2484_vm5, %v462_v13, %v3105_v0 }
  0xd0   : > { %1241 = vrot.lane.b32.xlu1 %v2967_v42, %s2322_s9  ;;  %v477_v52 = vsel %vm2484_vm5, %v472_v8, %v476_v48  ;;  %v1405_v44 = vsel %vm1401_vm9, %v1372_v55, %v2959_v39  ;;  %v830_v60 = vrot.slane %v828_v46, 4  ;;  %v847_v8 = vshrl.u32 %v278_v43, 16 }
  0xd1   : > { %v1253_v21 = vpop.permute.xlu0 %1252  ;;  %v669_v15 = vsel %vm2484_vm5, %v664_v11, %v668_v27  ;;  %v3193_v58 = vcombine.low %v467_v54, %v477_v52  ;;  %v843_v63 = vshll.u32 %v278_v43, 16 }
  0xd2   : > { %v1304_v35 = vpop.permute.xlu1 %1303  ;;  %v3154_v33 = vcombine.low %v659_v30, %v669_v15  ;;  %v1535_v11 = vsel %vm1533_vm13, %v1502_v7, %v1253_v21  ;;  %v775_v30 = vrot.slane %v3103_v56, 5  ;;  %v277_v56 = vld [vmem:[%s2407_s30 + $0xc0] sm:$0xf] }
  0xd3   : > { %1192 = vrot.lane.b32.xlu0 %v3086_v23, %s2321_s8  ;;  %v1584_v6 = vsel %vm1566_vm14, %v1551_v5, %v1304_v35  ;;  %v2003_v5 = vrot.slane %v3006_v62, 9  ;;  %v831_v35 = vrot.slane %v3066_v26, 5  ;;  %v772_v62 = vrot.slane %v3059_v31, 5 }
  0xd4   : > { %1243 = vrot.lane.b32.xlu1 %v3090_v57, %s2322_s9  ;;  %2127 = vmatprep.mubr.msk.bf16.mxu1 %vm1626_vm15, %v1584_v6  ;;  %v1438_v6 = vsel %vm1434_vm10, %v1405_v44, %v2983_v50  ;;  %v834_v18 = vshrl.u32 %v277_v56, 16  ;;  %v837_v7 = vshll.u32 %v277_v56, 16  ;;  %v2054_v44 = vcombine.low %v277_v56, %v278_v43 }
  0xd5   : > { %v1255_v24 = vpop.permute.xlu0 %1254  ;;  %v1471_v0 = vsel %vm1467_vm11, %v1438_v6, %v3029_v14  ;;  %v829_v47 = vsel %vm2439_vm4, %v2003_v5, %v828_v46  ;;  %v832_v14 = vsel %vm2439_vm4, %v830_v60, %v831_v35  ;;  %v845_v46 = vrot.slane %v843_v63, 5 }
  0xd6   : > { %v3140_v22 = vpop.permute.xlu1 %1017  ;;  %v1504_v39 = vsel %vm1500_vm12, %v1471_v0, %v3080_v36  ;;  %v3213_v31 = vcombine.low %v829_v47, %v832_v14  ;;  %v1995_v36 = vrot.slane %v3054_v17, 9 }
  0xd7   : > { %1225 = vrot.lane.b32.xlu0 %v2996_v20, %s2322_s9  ;;  %v1537_v50 = vsel %vm1533_vm13, %v1504_v39, %v1255_v24  ;;  %v774_v24 = vrot.slane %v772_v62, 4 }
  0xd8   : > { %1276 = vrot.lane.b32.xlu1 %v3001_v29, %s2323_s18 }
  0xd9   : > { %v1288_v27 = vpop.permute.xlu0 %1287  ;;  %v776_v61 = vsel %vm2439_vm4, %v774_v24, %v775_v30  ;;  %v3288_v30 = vld [vmem:[%s2407_s30 + $0xcc] sm:$0xf] }
  0xda   : > { %v1568_v38 = vsel %vm1566_vm14, %v1535_v11, %v1288_v27  ;;  %v1306_v49 = vpop.permute.xlu1 %1305  ;;  %v836_v11 = vrot.slane %v834_v18, 4  ;;  %v839_v27 = vrot.slane %v837_v7, 5 }
  0xdb   : > { %1227 = vrot.lane.b32.xlu0 %v3138_v2, %s2322_s9  ;;  %2111 = vmatprep.mubr.msk.bf16.mxu0 %vm1626_vm15, %v1568_v38  ;;  %v1586_v10 = vsel %vm1566_vm14, %v1553_v25, %v1306_v49  ;;  %v849_v25 = vrot.slane %v847_v8, 4  ;;  %v279_v49 = vld [vmem:[%s2407_s30 + $0xc8] sm:$0x1] }
  0xdc   : > { %1278 = vrot.lane.b32.xlu1 %v3154_v33, %s2323_s18  ;;  %2128 = vmatmul.mubr.msk.bf16.vlgmr.msra.gmra.mrb[0].mxu1 %vm1626_vm15, %v1586_v10  ;;  %v840_v55 = vor.u32 %v839_v27, %v836_v11  ;;  %v865_v24 = vrot.slane %v279_v49, 5 }
  0xdd   : > { %v3181_v21 = vpop.permute.xlu0 %1001  ;;  %v850_v54 = vor.u32 %v849_v25, %v845_v46 }
  0xde   : > { %v3187_v28 = vpop.permute.xlu1 %1019  ;;  %v841_v60 = vrot.slane %v840_v55, 4 }
  0xdf   : > { %1260 = vrot.lane.b32.xlu0 %v3041_v45, %s2323_s18  ;;  %v851_v35 = vrot.slane %v850_v54, 4 }
  0xe0   : > { %1311 = vrot.lane.b32.xlu1 %v3051_v34, %s2324_s23 }
  0xe1   : > { %v1290_v26 = vpop.permute.xlu0 %1289 }
  0xe2   : > { %v1570_v19 = vsel %vm1566_vm14, %v1537_v50, %v1290_v26  ;;  %v3206_v53 = vpop.permute.xlu1 %1097  ;;  %v862_v50 = vrot.slane %v278_v43, 5  ;;  %v871_v43 = vshll.u32 %v3288_v30, 16 }
  0xe3   : > { %1262 = vrot.lane.b32.xlu0 %v3193_v58, %s2323_s18  ;;  %2112 = vmatmul.mubr.msk.bf16.vlgmr.msra.gmra.mrb[0].mxu0 %vm1626_vm15, %v1570_v19  ;;  %v2004_v19 = vrot.slane %v277_v56, 9 }
  0xe4   : > { %1025 = vrot.lane.b32.xlu1 %v3001_v29, %s2319_s6  ;;  %v773_v29 = vsel %vm2439_vm4, %v1995_v36, %v772_v62  ;;  %v864_v36 = vrot.slane %v862_v50, 4  ;;  %v873_v25 = vrot.slane %v871_v43, 5 }
  0xe5   : > { %v3217_v15 = vpop.permute.xlu0 %1003  ;;  %v3237_v13 = vcombine.low %v773_v29, %v776_v61  ;;  %v3291_v61 = vld [vmem:[%s2407_s30 + $0xd0] sm:$0xf]  ;;  %v863_v56 = vsel %vm2439_vm4, %v2004_v19, %v862_v50 }
  0xe6   : > { %v3219_v59 = vpop.permute.xlu1 %1099  ;;  %v866_v7 = vsel %vm2439_vm4, %v864_v36, %v865_v24  ;;  %v881_v8 = vshrl.u32 %v3291_v61, 16  ;;  %v877_v63 = vshll.u32 %v3291_v61, 16 }
  0xe7   : > { %1295 = vrot.lane.b32.xlu0 %v3086_v23, %s2324_s23  ;;  %v3311_v27 = vcombine.low %v863_v56, %v866_v7 }
  0xe8   : > { %1313 = vrot.lane.b32.xlu1 %v3213_v31, %s2324_s23  ;;  %v879_v55 = vrot.slane %v877_v63, 5  ;;  %v883_v54 = vrot.slane %v881_v8, 4 }
  0xe9   : > { %v3229_v17 = vpop.permute.xlu0 %1081 }
  0xea   : > { %v3231_v3 = vpop.permute.xlu1 %1132 }
  0xeb   : > { %1009 = vrot.lane.b32.xlu0 %v3041_v45, %s2319_s6 }
  0xec   : > { %1027 = vrot.lane.b32.xlu1 %v3154_v33, %s2319_s6 }
  0xed   : > { %v3241_v48 = vpop.permute.xlu0 %1083 }
  0xee   : > { %v3243_v12 = vpop.permute.xlu1 %1134 }
  0xef   : > { %1297 = vrot.lane.b32.xlu0 %v3237_v13, %s2324_s23 }
  0xf0   : > { %1105 = vrot.lane.b32.xlu1 %v3051_v34, %s2318_s5  ;;  %v853_v34 = vshll.u32 %v279_v49, 16 }
  0xf1   : > { %v3249_v45 = vpop.permute.xlu0 %1116 }
  0xf2   : > { %v3251_v38 = vpop.permute.xlu1 %1167  ;;  %v855_v6 = vrot.slane %v853_v34, 5 }
  0xf3   : > { %1011 = vrot.lane.b32.xlu0 %v3193_v58, %s2319_s6  ;;  %s3513_s6 = scalar_lea.vmem [#allocation2], %s1986_s29 }
  0xf4   : > { %1107 = vrot.lane.b32.xlu1 %v3213_v31, %s2318_s5  ;;  %v856_v62 = vsel %vm2484_vm5, %v851_v35, %v855_v6 }
  0xf5   : > { %v3258_v10 = vpop.permute.xlu0 %1118 }
  0xf6   : > { %v3260_v52 = vpop.permute.xlu1 %1169 }
  0xf7   : > { %1089 = vrot.lane.b32.xlu0 %v3086_v23, %s2318_s5  ;;  %v846_v23 = vsel %vm2484_vm5, %v841_v60, %v845_v46  ;;  %v3314_v60 = vld [vmem:[%s2407_s30 + $0xd4] sm:$0x1] }
  0xf8   : > { %1140 = vrot.lane.b32.xlu1 %v3090_v57, %s2317_s4  ;;  %v3283_v47 = vcombine.low %v846_v23, %v856_v62  ;;  %v884_v23 = vor.u32 %v883_v54, %v879_v55  ;;  %v887_v62 = vshll.u32 %v3314_v60, 16  ;;  %v899_v54 = vrot.slane %v3314_v60, 5 }
  0xf9   : > { %v3266_v5 = vpop.permute.xlu0 %1151 }
  0xfa   : > { %v1203_v0 = vpop.permute.xlu1 %1202  ;;  %v885_v43 = vrot.slane %v884_v23, 4 }
  0xfb   : > { %1091 = vrot.lane.b32.xlu0 %v3237_v13, %s2318_s5 }
  0xfc   : > { %1142 = vrot.lane.b32.xlu1 %v2054_v44, %s2317_s4 }
  0xfd   : > { %v3271_v39 = vpop.permute.xlu0 %1153 }
  0xfe   : > { %v3277_v26 = vpop.permute.xlu1 %1204 }
  0xff   : > { %1124 = vrot.lane.b32.xlu0 %v3138_v2, %s2317_s4 }
 0x100   : > { %1175 = vrot.lane.b32.xlu1 %v3154_v33, %s2320_s7  ;;  %v868_v33 = vshrl.u32 %v3288_v30, 16 }
 0x101   : > { %v3285_v14 = vpop.permute.xlu0 %1186 }
 0x102   : > { %v1238_v29 = vpop.permute.xlu1 %1237  ;;  %v870_v46 = vrot.slane %v868_v33, 4 }
 0x103   : > { %1126 = vrot.lane.b32.xlu0 %v3015_v40, %s2317_s4 }
 0x104   : > { %1177 = vrot.lane.b32.xlu1 %v3283_v47, %s2320_s7 }
 0x105   : > { %v3299_v18 = vpop.permute.xlu0 %1188 }
 0x106   : > { %v1240_v11 = vpop.permute.xlu1 %1239 }
 0x107   : > { %1159 = vrot.lane.b32.xlu0 %v3193_v58, %s2320_s7  ;;  %v1352_v58 = vsel %vm1319_vm7, %v2560_v9, %v3140_v22  ;;  %v2057_v22 = vcombine.low %v3288_v30, %v3291_v61 }
 0x108   : > { %1210 = vrot.lane.b32.xlu1 %v3213_v31, %s2321_s8  ;;  %v874_v31 = vor.u32 %v873_v25, %v870_v46  ;;  %v1390_v35 = vsel %vm1368_vm8, %v1352_v58, %v3206_v53 }
 0x109   : > { %v1222_v49 = vpop.permute.xlu0 %1221  ;;  %v1423_v50 = vsel %vm1401_vm9, %v1390_v35, %v3231_v3  ;;  %v889_v3 = vrot.slane %v887_v62, 5 }
 0x10a   : > { %v1273_v34 = vpop.permute.xlu1 %1272  ;;  %v1456_v36 = vsel %vm1434_vm10, %v1423_v50, %v3251_v38  ;;  %v875_v53 = vrot.slane %v874_v31, 4 }
 0x10b   : > { %1161 = vrot.lane.b32.xlu0 %v2572_v1, %s2320_s7  ;;  %v1489_v9 = vsel %vm1467_vm11, %v1456_v36, %v1203_v0  ;;  %v3661_v36 = vld [vmem:[#allocation5_spill] sm:$0xff]  ;;  %s2085_s7 = sshll.u32 %s2307_s15, 12  ;;  %s3588_s15 = scalar_lea.sflag [#allocation3], %s208_s28 }
 0x10c   : > { %1212 = vrot.lane.b32.xlu1 %v3311_v27, %s2321_s8  ;;  %v1522_v24 = vsel %vm1500_vm12, %v1489_v9, %v1238_v29  ;;  %v880_v29 = vsel %vm2484_vm5, %v875_v53, %v879_v55  ;;  %s3578_s11 = scalar_lea.hbm %s3638_s3, %s2085_s7 }
 0x10d   : > { %v3325_v6 = vpop.permute.xlu0 %1223  ;;  %v1555_v56 = vsel %vm1533_vm13, %v1522_v24, %v1273_v34 }
 0x10e   : > { %v1275_v19 = vpop.permute.xlu1 %1274 }
 0x10f   : > { %1194 = vrot.lane.b32.xlu0 %v3237_v13, %s2321_s8  ;;  %v1328_v13 = vsel %vm1319_vm7, %v2579_v37, %v3181_v21 }
 0x110   : > { %1245 = vrot.lane.b32.xlu1 %v2054_v44, %s2322_s9  ;;  %v1355_v44 = vsel %vm1319_vm7, %v2651_v32, %v3187_v28  ;;  %v1374_v0 = vsel %vm1368_vm8, %v1328_v13, %v3229_v17  ;;  %v890_v32 = vsel %vm2484_vm5, %v885_v43, %v889_v3  ;;  %v896_v28 = vrot.slane %v3291_v61, 5 }
 0x111   : > { %v1257_v33 = vpop.permute.xlu0 %1256  ;;  %v1392_v37 = vsel %vm1368_vm8, %v1355_v44, %v3219_v59  ;;  %v1407_v21 = vsel %vm1401_vm9, %v1374_v0, %v3249_v45 }
 0x112   : > { %v1308_v7 = vpop.permute.xlu1 %1307  ;;  %v1425_v17 = vsel %vm1401_vm9, %v1392_v37, %v3243_v12  ;;  %v1440_v63 = vsel %vm1434_vm10, %v1407_v21, %v3266_v5  ;;  %v2058_v12 = vcombine.low %v880_v29, %v890_v32  ;;  %v2005_v5 = vrot.slane %v3288_v30, 9  ;;  %v3662_v21 = vld [vmem:[#allocation8_spill] sm:$0xff] }
 0x113   : > { %1196 = vrot.lane.b32.xlu0 %v2470_v41, %s2321_s8  ;;  %v1588_v38 = vsel %vm1566_vm14, %v1555_v56, %v1308_v7  ;;  %v1458_v59 = vsel %vm1434_vm10, %v1425_v17, %v3260_v52  ;;  %v1473_v45 = vsel %vm1467_vm11, %v1440_v63, %v3285_v14  ;;  %v898_v14 = vrot.slane %v896_v28, 4  ;;  %s1873_s8 = sshll.u32 %s3513_s6, 4  ;;  %s3582_s8 = int_to_ptr.vmem [resolvable:$true] %s1873_s8 }
 0x114   : > { %1247 = vrot.lane.b32.xlu1 %v2057_v22, %s2322_s9  ;;  %2131 = vmatprep.mubr.msk.bf16.mxu1 %vm1626_vm15, %v1588_v38  ;;  %v1491_v51 = vsel %vm1467_vm11, %v1458_v59, %v3277_v26  ;;  %v1506_v61 = vsel %vm1500_vm12, %v1473_v45, %v1222_v49  ;;  %v3659_v49 = vld [vmem:[#allocation7_spill] sm:$0xff]  ;;  %p2244_p1 = scmp.lt.s32.totalorder %s3582_s8, %s2242_s21 }
 0x115   : > { %v1259_v8 = vpop.permute.xlu0 %1258  ;;  %v1524_v25 = vsel %vm1500_vm12, %v1491_v51, %v1240_v11  ;;  %v1539_v52 = vsel %vm1533_vm13, %v1506_v61, %v1257_v33 }
 0x116   : > { %v3366_v46 = vpop.permute.xlu1 %1021 }
 0x117   : > { %1229 = vrot.lane.b32.xlu0 %v3015_v40, %s2322_s9  ;;  %v1557_v40 = vsel %vm1533_vm13, %v1524_v25, %v1275_v19  ;;  %v3660_v19 = vld [vmem:[#allocation6_spill] sm:$0xff]  ;;  %v3663_v25 = vld [vmem:[#allocation9_spill] sm:$0xff] }
 0x118   : > { %1280 = vrot.lane.b32.xlu1 %v3283_v47, %s2323_s18  ;;  %v1331_v47 = vsel %vm1319_vm7, %v3659_v49, %v3217_v15  ;;  %v897_v15 = vsel %vm2439_vm4, %v2005_v5, %v896_v28 }
 0x119   : > { %v1292_v55 = vpop.permute.xlu0 %1291  ;;  %v1376_v11 = vsel %vm1368_vm8, %v1331_v47, %v3241_v48 }
 0x11a   : > { %v1572_v26 = vsel %vm1566_vm14, %v1539_v52, %v1292_v55  ;;  %v1310_v34 = vpop.permute.xlu1 %1309  ;;  %v1409_v60 = vsel %vm1401_vm9, %v1376_v11, %v3258_v10  ;;  %v3664_v55 = vld [vmem:[#allocation10_spill] sm:$0xff] }
 0x11b   : > { %1231 = vrot.lane.b32.xlu0 %v2419_v4, %s2322_s9  ;;  %2115 = vmatprep.mubr.msk.bf16.mxu0 %vm1626_vm15, %v1572_v26  ;;  %v1590_v30 = vsel %vm1566_vm14, %v1557_v40, %v1310_v34  ;;  %v900_v4 = vsel %vm2439_vm4, %v898_v14, %v899_v54  ;;  %v1442_v31 = vsel %vm1434_vm10, %v1409_v60, %v3271_v39 }
 0x11c   : > { %1282 = vrot.lane.b32.xlu1 %v2058_v12, %s2323_s18  ;;  %2132 = vmatmul.mubr.msk.bf16.gmra.mrb[4].mxu1 %vm1626_vm15, %v1590_v30  ;;  %v1475_v48 = vsel %vm1467_vm11, %v1442_v31, %v3299_v18  ;;  %v2059_v23 = vcombine.low %v897_v15, %v900_v4 }
 0x11d   : > { %v1006_v58 = vpop.permute.xlu0 %1005  ;;  %v1508_v10 = vsel %vm1500_vm12, %v1475_v48, %v3325_v6 }
 0x11e   : > { %v1024_v35 = vpop.permute.xlu1 %1023  ;;  %v1541_v16 = vsel %vm1533_vm13, %v1508_v10, %v1259_v8  ;;  %v1358_v8 = vsel %vm1319_vm7, %v3662_v21, %v3366_v46  ;;  %v1334_v52 = vsel %vm1319_vm7, %v3663_v25, %v1006_v58 }
 0x11f   : > { %1264 = vrot.lane.b32.xlu0 %v2572_v1, %s2323_s18  ;;  %v1361_v14 = vsel %vm1319_vm7, %v3664_v55, %v1024_v35 }
 0x120   : > { %1315 = vrot.lane.b32.xlu1 %v3311_v27, %s2324_s23 }
 0x121   : > { %v1294_v62 = vpop.permute.xlu0 %1293 }
 0x122   : > { %v1574_v50 = vsel %vm1566_vm14, %v1541_v16, %v1294_v62  ;;  %v1102_v39 = vpop.permute.xlu1 %1101  ;;  %v3665_v16 = vld [vmem:[#allocation11_spill] sm:$0xff] }
 0x123   : > { %1266 = vrot.lane.b32.xlu0 %v3660_v19, %s2323_s18  ;;  %2116 = vmatmul.mubr.msk.bf16.gmra.mrb[4].mxu0 %vm1626_vm15, %v1574_v50  ;;  %v1394_v32 = vsel %vm1368_vm8, %v1358_v8, %v1102_v39  ;;  %s2237_s18 = scalar_lea.vmem %s3582_s8, 4096 }
 0x124   : > { %1317 = vrot.lane.b32.xlu1 %v2059_v23, %s2324_s23  ;;  %p2238_p12 = scmp.ne.s32.totalorder %s3582_s8, %s2237_s18 }
 0x125   : > { %v1008_v1 = vpop.permute.xlu0 %1007 }
 0x126   : > { %v1104_v18 = vpop.permute.xlu1 %1103  ;;  %v1337_v62 = vsel %vm1319_vm7, %v3665_v16, %v1008_v1  ;;  %p2239_p13 = pnand %p2238_p12, %p2387_p4 }
 0x127   : > { %1299 = vrot.lane.b32.xlu0 %v2470_v41, %s2324_s23  ;;  %v1396_v40 = vsel %vm1368_vm8, %v1361_v14, %v1104_v18 }
 0x128   : > { %p2240_p0 = pneg %p2239_p13 }
 0x129   : > { %v1086_v27 = vpop.permute.xlu0 %1085 }
 0x12a   : > { %v1137_v6 = vpop.permute.xlu1 %1136  ;;  %v1378_v54 = vsel %vm1368_vm8, %v1334_v52, %v1086_v27 }
 0x12b   : > { %1301 = vrot.lane.b32.xlu0 %v3661_v36, %s2324_s23  ;;  %v1427_v17 = vsel %vm1401_vm9, %v1394_v32, %v1137_v6  ;;  %s2243_s23 = scalar_lea.vmem %s2242_s21, 8192 }
 0x12c   : > { %p2245_p2 = scmp.lt.s32.totalorder %s2243_s23, %s2237_s18 }
 0x12d   : > { %v1088_v9 = vpop.permute.xlu0 %1087 }
 0x12e   : > { %v1139_v22 = vpop.permute.xlu1 %1138  ;;  %v1380_v39 = vsel %vm1368_vm8, %v1337_v62, %v1088_v9  ;;  %p2246_p3 = por %p2245_p2, %p2244_p1 }
 0x12f   : > { %v1429_v49 = vsel %vm1401_vm9, %v1396_v40, %v1139_v22 }
 0x130   : > { %p2247_p5 = pnand %p2246_p3, %p2240_p0 }
 0x131   : > { %v1121_v53 = vpop.permute.xlu0 %1120 }
 0x132   : > { %v1172_v24 = vpop.permute.xlu1 %1171  ;;  %v1411_v26 = vsel %vm1401_vm9, %v1378_v54, %v1121_v53 }
 0x133   : > { %v1460_v59 = vsel %vm1434_vm10, %v1427_v17, %v1172_v24 }
 0x135   : > { %v1123_v33 = vpop.permute.xlu0 %1122 }
 0x136   : > { %v1174_v43 = vpop.permute.xlu1 %1173  ;;  %v1413_v19 = vsel %vm1401_vm9, %v1380_v39, %v1123_v33 }
 0x137   : > { %v1462_v11 = vsel %vm1434_vm10, %v1429_v49, %v1174_v43 }
 0x139   : > { %v1156_v3 = vpop.permute.xlu0 %1155 }
 0x13a   : > { %v1207_v56 = vpop.permute.xlu1 %1206  ;;  %v1444_v47 = vsel %vm1434_vm10, %v1411_v26, %v1156_v3 }
 0x13b   : > { %v1493_v45 = vsel %vm1467_vm11, %v1460_v59, %v1207_v56 }
 0x13d   : > { %v1158_v7 = vpop.permute.xlu0 %1157 }
 0x13e   : > { %v1209_v13 = vpop.permute.xlu1 %1208  ;;  %v1446_v27 = vsel %vm1434_vm10, %v1413_v19, %v1158_v7 }
 0x13f   : > { %v1495_v58 = vsel %vm1467_vm11, %v1462_v11, %v1209_v13 }
 0x141   : > { %v1191_v38 = vpop.permute.xlu0 %1190 }
 0x142   : > { %v1242_v44 = vpop.permute.xlu1 %1241  ;;  %v1477_v60 = vsel %vm1467_vm11, %v1444_v47, %v1191_v38 }
 0x143   : > { %v1526_v51 = vsel %vm1500_vm12, %v1493_v45, %v1242_v44 }
 0x145   : > { %v1193_v0 = vpop.permute.xlu0 %1192 }
 0x146   : > { %v1244_v29 = vpop.permute.xlu1 %1243  ;;  %v1479_v36 = vsel %vm1467_vm11, %v1446_v27, %v1193_v0 }
 0x147   : > { %v1528_v4 = vsel %vm1500_vm12, %v1495_v58, %v1244_v29 }
 0x149   : > { %v1226_v41 = vpop.permute.xlu0 %1225 }
 0x14a   : > { %v1277_v37 = vpop.permute.xlu1 %1276  ;;  %v1510_v15 = vsel %vm1500_vm12, %v1477_v60, %v1226_v41 }
 0x14b   : > { %v1559_v12 = vsel %vm1533_vm13, %v1526_v51, %v1277_v37 }
 0x14d   : > { %v1228_v28 = vpop.permute.xlu0 %1227 }
 0x14e   : > { %v1279_v63 = vpop.permute.xlu1 %1278  ;;  %v1512_v22 = vsel %vm1500_vm12, %v1479_v36, %v1228_v28 }
 0x14f   : > { %v1561_v48 = vsel %vm1533_vm13, %v1528_v4, %v1279_v63 }
 0x151   : > { %v1261_v61 = vpop.permute.xlu0 %1260 }
 0x152   : > { %v1312_v5 = vpop.permute.xlu1 %1311  ;;  %v1543_v31 = vsel %vm1533_vm13, %v1510_v15, %v1261_v61 }
 0x153   : > { %v1592_v46 = vsel %vm1566_vm14, %v1559_v12, %v1312_v5 }
 0x154   : > { %2135 = vmatprep.mubr.msk.bf16.mxu1 %vm1626_vm15, %v1592_v46 }
 0x155   : > { %v1263_v34 = vpop.permute.xlu0 %1262 }
 0x156   : > { %v1026_v30 = vpop.permute.xlu1 %1025  ;;  %v1545_v1 = vsel %vm1533_vm13, %v1512_v22, %v1263_v34 }
 0x157   : > { %v1364_v51 = vsel %vm1319_vm7, %v2967_v42, %v1026_v30 }
 0x159   : > { %v1296_v35 = vpop.permute.xlu0 %1295 }
 0x15a   : > { %v1576_v10 = vsel %vm1566_vm14, %v1543_v31, %v1296_v35  ;;  %v1314_v23 = vpop.permute.xlu1 %1313 }
 0x15b   : > { %2119 = vmatprep.mubr.msk.bf16.mxu0 %vm1626_vm15, %v1576_v10  ;;  %v1594_v50 = vsel %vm1566_vm14, %v1561_v48, %v1314_v23 }
 0x15c   : > { %2136 = vmatmul.mubr.msk.bf16.gmra.mrb[8].mxu1 %vm1626_vm15, %v1594_v50 }
 0x15d   : > { %v1010_v18 = vpop.permute.xlu0 %1009 }
 0x15e   : > { %v1028_v6 = vpop.permute.xlu1 %1027  ;;  %v1340_v49 = vsel %vm1319_vm7, %v2996_v20, %v1010_v18 }
 0x15f   : > { %v1367_v46 = vsel %vm1319_vm7, %v3090_v57, %v1028_v6 }
 0x161   : > { %v1298_v53 = vpop.permute.xlu0 %1297 }
 0x162   : > { %v1578_v24 = vsel %vm1566_vm14, %v1545_v1, %v1298_v53  ;;  %v1106_v43 = vpop.permute.xlu1 %1105  ;;  %v3509_v1 = vld [vmem:[%s3637_s2] ss:$0 sm:$0xff] }
 0x163   : > { %2120 = vmatmul.mubr.msk.bf16.gmra.mrb[8].mxu0 %vm1626_vm15, %v1578_v24  ;;  %v1398_v61 = vsel %vm1368_vm8, %v1364_v51, %v1106_v43 }
 0x165   : > { %v1012_v9 = vpop.permute.xlu0 %1011 }
 0x166   : > { %v1108_v3 = vpop.permute.xlu1 %1107  ;;  %v1343_v35 = vsel %vm1319_vm7, %v3138_v2, %v1012_v9 }
 0x167   : > { %v1400_v14 = vsel %vm1368_vm8, %v1367_v46, %v1108_v3 }
 0x169   : > { %v1090_v56 = vpop.permute.xlu0 %1089 }
 0x16a   : > { %v1141_v33 = vpop.permute.xlu1 %1140  ;;  %v1382_v57 = vsel %vm1368_vm8, %v1340_v49, %v1090_v56 }
 0x16b   : > { %v1431_v5 = vsel %vm1401_vm9, %v1398_v61, %v1141_v33 }
 0x16d   : > { %v1092_v13 = vpop.permute.xlu0 %1091 }
 0x16e   : > { %v1143_v38 = vpop.permute.xlu1 %1142  ;;  %v1384_v23 = vsel %vm1368_vm8, %v1343_v35, %v1092_v13 }
 0x16f   : > { %v1433_v42 = vsel %vm1401_vm9, %v1400_v14, %v1143_v38 }
 0x171   : > { %v1125_v7 = vpop.permute.xlu0 %1124 }
 0x172   : > { %v1176_v44 = vpop.permute.xlu1 %1175  ;;  %v1415_v60 = vsel %vm1401_vm9, %v1382_v57, %v1125_v7 }
 0x173   : > { %v1464_v52 = vsel %vm1434_vm10, %v1431_v5, %v1176_v44 }
 0x175   : > { %v1127_v29 = vpop.permute.xlu0 %1126 }
 0x176   : > { %v1178_v0 = vpop.permute.xlu1 %1177  ;;  %v1417_v62 = vsel %vm1401_vm9, %v1384_v23, %v1127_v29 }
 0x177   : > { %v1466_v47 = vsel %vm1434_vm10, %v1433_v42, %v1178_v0 }
 0x179   : > { %v1160_v41 = vpop.permute.xlu0 %1159 }
 0x17a   : > { %v1211_v37 = vpop.permute.xlu1 %1210  ;;  %v1448_v4 = vsel %vm1434_vm10, %v1415_v60, %v1160_v41 }
 0x17b   : > { %v1497_v55 = vsel %vm1467_vm11, %v1464_v52, %v1211_v37 }
 0x17d   : > { %v1162_v21 = vpop.permute.xlu0 %1161 }
 0x17e   : > { %v1213_v8 = vpop.permute.xlu1 %1212  ;;  %v1450_v19 = vsel %vm1434_vm10, %v1417_v62, %v1162_v21 }
 0x17f   : > { %v1499_v11 = vsel %vm1467_vm11, %v1466_v47, %v1213_v8 }
 0x181   : > { %v1195_v32 = vpop.permute.xlu0 %1194 }
 0x182   : > { %v1246_v28 = vpop.permute.xlu1 %1245  ;;  %v1481_v48 = vsel %vm1467_vm11, %v1448_v4, %v1195_v32 }
 0x183   : > { %v1530_v54 = vsel %vm1500_vm12, %v1497_v55, %v1246_v28 }
 0x185   : > { %v1197_v17 = vpop.permute.xlu0 %1196 }
 0x186   : > { %v1248_v63 = vpop.permute.xlu1 %1247  ;;  %v1483_v18 = vsel %vm1467_vm11, %v1450_v19, %v1197_v17 }
 0x187   : > { %v1532_v58 = vsel %vm1500_vm12, %v1499_v11, %v1248_v63 }
 0x189   : > { %v1230_v59 = vpop.permute.xlu0 %1229 }
 0x18a   : > { %v1281_v45 = vpop.permute.xlu1 %1280  ;;  %v1514_v16 = vsel %vm1500_vm12, %v1481_v48, %v1230_v59 }
 0x18b   : > { %v1563_v26 = vsel %vm1533_vm13, %v1530_v54, %v1281_v45 }
 0x18d   : > { %v1232_v12 = vpop.permute.xlu0 %1231 }
 0x18e   : > { %v1283_v25 = vpop.permute.xlu1 %1282  ;;  %v1516_v27 = vsel %vm1500_vm12, %v1483_v18, %v1232_v12 }
 0x18f   : > { %v1565_v31 = vsel %vm1533_vm13, %v1532_v58, %v1283_v25 }
 0x191   : > { %v1265_v40 = vpop.permute.xlu0 %1264 }
 0x192   : > { %v1316_v34 = vpop.permute.xlu1 %1315  ;;  %v1547_v50 = vsel %vm1533_vm13, %v1514_v16, %v1265_v40 }
 0x193   : > { %v1596_v30 = vsel %vm1566_vm14, %v1563_v26, %v1316_v34 }
 0x194   : > { %2139 = vmatprep.mubr.msk.bf16.mxu1 %vm1626_vm15, %v1596_v30 }
 0x195   : > { %v1267_v15 = vpop.permute.xlu0 %1266 }
 0x196   : > { %v1318_v20 = vpop.permute.xlu1 %1317  ;;  %v1549_v6 = vsel %vm1533_vm13, %v1516_v27, %v1267_v15 }
 0x197   : > { %v1598_v10 = vsel %vm1566_vm14, %v1565_v31, %v1318_v20 }
 0x198   : > { %2140 = vmatmul.mubr.msk.bf16.gmra.mrb[12].mxu1 %vm1626_vm15, %v1598_v10 }
 0x199   : > { %v1300_v39 = vpop.permute.xlu0 %1299 }
 0x19a   : > { %v1580_v2 = vsel %vm1566_vm14, %v1547_v50, %v1300_v39 }
 0x19b   : > { %2123 = vmatprep.mubr.msk.bf16.mxu0 %vm1626_vm15, %v1580_v2 }
 0x19d   : > { %v1302_v36 = vpop.permute.xlu0 %1301 }
 0x19e   : > { %v1582_v22 = vsel %vm1566_vm14, %v1549_v6, %v1302_v36 }
 0x19f   : > { %2124 = vmatmul.mubr.msk.bf16.gmra.mrb[12].mxu0 %vm1626_vm15, %v1582_v22 }
 0x1af   : > { %v2129_v53 = vpop.f32.mrb[0].mxu1 }
 0x1b0   : > { %v1770_v24 = vadd.f32 %v2129_v53, %v3509_v1  ;;  %v1761_v43 = vpop.f32.mrb[1].mxu1 }
 0x1b1   : > { %v1762_v9 = vadd.f32 %v3509_v1, %v1761_v43  ;;  %v2130_v3 = vpop.f32.mrb[2].mxu1 }
 0x1b2   : > { %1842 = vst [vmem:[%s3513_s6 + $0x90] sm:$0xff] %v1770_v24  ;;  %v1773_v56 = vadd.f32 %v2130_v3, %v3509_v1  ;;  %v1764_v33 = vpop.f32.mrb[3].mxu1 }
 0x1b3   : > { %1840 = vst [vmem:[%s3513_s6 + $0x80] sm:$0xff] %v1762_v9  ;;  %v1765_v13 = vadd.f32 %v3509_v1, %v1764_v33 }
 0x1b4   : > { %1843 = vst [vmem:[%s3513_s6 + $0x98] sm:$0xff] %v1773_v56 }
 0x1b5   : > { %1841 = vst [vmem:[%s3513_s6 + $0x88] sm:$0xff] %v1765_v13 }
 0x1b6   : > { %v2113_v38 = vpop.f32.mrb[0].mxu0 }
 0x1b7   : > { %v1706_v7 = vadd.f32 %v2113_v38, %v3509_v1  ;;  %v1697_v44 = vpop.f32.mrb[1].mxu0 }
 0x1b8   : > { %v1698_v29 = vadd.f32 %v3509_v1, %v1697_v44  ;;  %v2114_v0 = vpop.f32.mrb[2].mxu0 }
 0x1b9   : > { %1826 = vst [vmem:[%s3513_s6 + $0x10] sm:$0xff] %v1706_v7  ;;  %v1709_v41 = vadd.f32 %v2114_v0, %v3509_v1  ;;  %v1700_v37 = vpop.f32.mrb[3].mxu0 }
 0x1ba   : > { %1824 = vst [vmem:[%s3513_s6] sm:$0xff] %v1698_v29  ;;  %v1701_v21 = vadd.f32 %v3509_v1, %v1700_v37 }
 0x1bb   : > { %1827 = vst [vmem:[%s3513_s6 + $0x18] sm:$0xff] %v1709_v41 }
 0x1bc   : > { %1825 = vst [vmem:[%s3513_s6 + $0x8] sm:$0xff] %v1701_v21 }
 0x1ef   : > { %v2133_v8 = vpop.f32.mrb[4].mxu1 }
 0x1f0   : > { %v1786_v32 = vadd.f32 %v2133_v8, %v3509_v1  ;;  %v1777_v28 = vpop.f32.mrb[5].mxu1 }
 0x1f1   : > { %v1778_v17 = vadd.f32 %v3509_v1, %v1777_v28  ;;  %v2134_v63 = vpop.f32.mrb[6].mxu1 }
 0x1f2   : > { %1846 = vst [vmem:[%s3513_s6 + $0xb0] sm:$0xff] %v1786_v32  ;;  %v1789_v59 = vadd.f32 %v2134_v63, %v3509_v1  ;;  %v1780_v45 = vpop.f32.mrb[7].mxu1 }
 0x1f3   : > { %1844 = vst [vmem:[%s3513_s6 + $0xa0] sm:$0xff] %v1778_v17  ;;  %v1781_v51 = vadd.f32 %v3509_v1, %v1780_v45 }
 0x1f4   : > { %1847 = vst [vmem:[%s3513_s6 + $0xb8] sm:$0xff] %v1789_v59 }
 0x1f5   : > { %1845 = vst [vmem:[%s3513_s6 + $0xa8] sm:$0xff] %v1781_v51 }
 0x1f6   : > { %v2117_v61 = vpop.f32.mrb[4].mxu0 }
 0x1f7   : > { %v1722_v12 = vadd.f32 %v2117_v61, %v3509_v1  ;;  %v1713_v5 = vpop.f32.mrb[5].mxu0 }
 0x1f8   : > { %v1714_v25 = vadd.f32 %v3509_v1, %v1713_v5  ;;  %v2118_v52 = vpop.f32.mrb[6].mxu0 }
 0x1f9   : > { %1830 = vst [vmem:[%s3513_s6 + $0x30] sm:$0xff] %v1722_v12  ;;  %v1725_v46 = vadd.f32 %v2118_v52, %v3509_v1  ;;  %v1716_v55 = vpop.f32.mrb[7].mxu0 }
 0x1fa   : > { %1828 = vst [vmem:[%s3513_s6 + $0x20] sm:$0xff] %v1714_v25  ;;  %v1717_v14 = vadd.f32 %v3509_v1, %v1716_v55 }
 0x1fb   : > { %1831 = vst [vmem:[%s3513_s6 + $0x38] sm:$0xff] %v1725_v46 }
 0x1fc   : > { %1829 = vst [vmem:[%s3513_s6 + $0x28] sm:$0xff] %v1717_v14 }
 0x22f   : > { %v2137_v54 = vpop.f32.mrb[8].mxu1 }
 0x230   : > { %v1802_v40 = vadd.f32 %v2137_v54, %v3509_v1  ;;  %v1793_v42 = vpop.f32.mrb[9].mxu1 }
 0x231   : > { %v1794_v26 = vadd.f32 %v3509_v1, %v1793_v42  ;;  %v2138_v34 = vpop.f32.mrb[10].mxu1 }
 0x232   : > { %1850 = vst [vmem:[%s3513_s6 + $0xd0] sm:$0xff] %v1802_v40  ;;  %v1805_v49 = vadd.f32 %v2138_v34, %v3509_v1  ;;  %v1796_v47 = vpop.f32.mrb[11].mxu1 }
 0x233   : > { %1848 = vst [vmem:[%s3513_s6 + $0xc0] sm:$0xff] %v1794_v26  ;;  %v1797_v30 = vadd.f32 %v3509_v1, %v1796_v47 }
 0x234   : > { %1851 = vst [vmem:[%s3513_s6 + $0xd8] sm:$0xff] %v1805_v49 }
 0x235   : > { %1849 = vst [vmem:[%s3513_s6 + $0xc8] sm:$0xff] %v1797_v30 }
 0x236   : > { %v2121_v57 = vpop.f32.mrb[8].mxu0 }
 0x237   : > { %v1738_v11 = vadd.f32 %v2121_v57, %v3509_v1  ;;  %v1729_v60 = vpop.f32.mrb[9].mxu0 }
 0x238   : > { %v1730_v58 = vadd.f32 %v3509_v1, %v1729_v60  ;;  %v2122_v15 = vpop.f32.mrb[10].mxu0 }
 0x239   : > { %1834 = vst [vmem:[%s3513_s6 + $0x50] sm:$0xff] %v1738_v11  ;;  %v1741_v4 = vadd.f32 %v2122_v15, %v3509_v1  ;;  %v1732_v31 = vpop.f32.mrb[11].mxu0 }
 0x23a   : > { %1832 = vst [vmem:[%s3513_s6 + $0x40] sm:$0xff] %v1730_v58  ;;  %v1733_v20 = vadd.f32 %v3509_v1, %v1732_v31 }
 0x23b   : > { %1835 = vst [vmem:[%s3513_s6 + $0x58] sm:$0xff] %v1741_v4 }
 0x23c   : > { %1833 = vst [vmem:[%s3513_s6 + $0x48] sm:$0xff] %v1733_v20 }
 0x26b   : > { %v2141_v35 = vpop.f32.mrb[12].mxu1 }
 0x26c   : > { %v1818_v48 = vadd.f32 %v2141_v35, %v3509_v1  ;;  %v1809_v10 = vpop.f32.mrb[13].mxu1 }
 0x26d   : > { %v1810_v23 = vadd.f32 %v3509_v1, %v1809_v10  ;;  %v2142_v16 = vpop.f32.mrb[14].mxu1 }
 0x26e   : > { %1854 = vst [vmem:[%s3513_s6 + $0xf0] sm:$0xff] %v1818_v48  ;;  %v1821_v62 = vadd.f32 %v2142_v16, %v3509_v1  ;;  %v1812_v50 = vpop.f32.mrb[15].mxu1 }
 0x26f   : > { %1852 = vst [vmem:[%s3513_s6 + $0xe0] sm:$0xff] %v1810_v23  ;;  %v1813_v39 = vadd.f32 %v3509_v1, %v1812_v50 }
 0x270   : > { %1855 = vst [vmem:[%s3513_s6 + $0xf8] sm:$0xff] %v1821_v62 }
 0x271   : > { %1853 = vst [vmem:[%s3513_s6 + $0xe8] sm:$0xff] %v1813_v39 }
 0x272   : > { %v2125_v19 = vpop.f32.mrb[12].mxu0 }
 0x273   : > { %v1754_v2 = vadd.f32 %v2125_v19, %v3509_v1  ;;  %v1745_v18 = vpop.f32.mrb[13].mxu0 }
 0x274   : > { %v1746_v27 = vadd.f32 %v3509_v1, %v1745_v18  ;;  %v2126_v6 = vpop.f32.mrb[14].mxu0 }
 0x275   : > { %1838 = vst [vmem:[%s3513_s6 + $0x70] sm:$0xff] %v1754_v2  ;;  %v1757_v36 = vadd.f32 %v2126_v6, %v3509_v1  ;;  %v1748_v22 = vpop.f32.mrb[15].mxu0 }
 0x276   : > { %1836 = vst [vmem:[%s3513_s6 + $0x60] sm:$0xff] %v1746_v27  ;;  %v1749_v53 = vadd.f32 %v3509_v1, %v1748_v22 }
 0x277   : > { %1839 = vst [vmem:[%s3513_s6 + $0x78] sm:$0xff] %v1757_v36 }
 0x278   : > { %1837 = vst [vmem:[%s3513_s6 + $0x68] sm:$0xff] %v1749_v53 }
 0x279   : > { %2250 = shalt.err (!%p2247_p5)
}
 0x27a   : > { %s2251_s26 = scalar_lea.hbm %s3578_s11, 4096  ;;  %s2255_s29 = scalar_lea.hbm %s3638_s3, 8192 }
 0x27b   : > { %p2252_p6 = scmp.ne.s32.totalorder %s3578_s11, %s2251_s26  ;;  %p2256_p10 = scmp.lt.u32.totalorder %s3578_s11, %s3638_s3 }
 0x27c   : > { %p2257_p11 = scmp.lt.u32.totalorder %s2255_s29, %s2251_s26  ;;  %p2259_p13 = scmp.lt.u32.totalorder %s2251_s26, %s3578_s11 }
 0x27d   : > { %p2253_p7 = pnand %p2252_p6, %p2387_p4 }
 0x27e   : > { %p2258_p12 = por %p2257_p11, %p2256_p10 }
 0x27f   : > { %p2254_p9 = pneg %p2253_p7 }
 0x280   : > { %p2260_p0 = por %p2259_p13, %p2258_p12 }
 0x282   : > { %p2261_p1 = pnand %p2260_p0, %p2254_p9 }
 0x284   : > { %2264 = shalt.err (!%p2261_p1)
}
 0x285   : > { %s2326_s6 = smov 128  }
 0x286   : > { %2152 = dma.vmem_to_hbm [thread:$0]  (%p2387_p4), %s3582_s8, 4096, %s3578_s11, %s3588_s15, %s2326_s6, %s2326_s6, %s2318_s5  }
 0x287 PF: > { %p2158_p2 = scmp.ge.s32.totalorder %s2315_s17, 2  ;;  %s1888_s7 = sand.u32 1, %s2295_s12  }
 0x288   : > { %s1889_s9 = scalar_lea.sflag [#allocation3], %s1888_s7 }
 0x289   : > { %p2155_p3 = pnand %p2158_p2, %p2394_p8 }
 0x28b   : > { %2290 = dma.done.wait (!%p2155_p3), %s1889_s9, 4096  }
 0x28c   : > { %2292 = vsyncadd (!%p2155_p3), %s1889_s9, 4294963200  ;;  %s16_s17 = sadd.s32 1, %s2315_s17   ;;  %s3666_s12 = smov %s2299_s13 }
 0x28d   : > { %p13_p5 = scmp.ge.s32.totalorder %s16_s17, 4   ;;  %s3667_s13 = smov %s2303_s14 }
 0x28e   : > { %s3668_s14 = smov %s2400_s25  ;;  %s3669_s15 = smov %s2311_s16 }
 0x28f   : > { %s3670_s16 = smov %s3672_s20  ;;  %15 = sbr.rel (!%p13_p5) target bundleno = 4 (0x4), region = 74 }
 0x296   :  { %1894 = vsyncpa [#allocation3], 1 }
 0x297   :  { %1896 = vsyncpa [#allocation3 + $0x1], 1 }

</bundles_post_ra>
